<compile_context>
chip_gen: v7x
topology: tpu7x:2x2x1
jax: 0.10.0
libtpu: 0.0.40
codegen_flags: <defaults>
</compile_context>

<pallas_src>
import functools

import jax
import jax.numpy as jnp
from jax.experimental import pallas as pl
from jax.experimental.pallas import tpu as pltpu


def _round_up(v, m):
    return ((v + m - 1) // m) * m


# ----------------------------------------------------------------------------
# Single fused kernel: hoisted layer-0 input projection + 2-layer GRU recurrence
# (unrolled in-kernel loop, vreg carries) + fused FC heads.  grid=() -> one
# invocation, everything VMEM-resident.
# ----------------------------------------------------------------------------
def _seld_kernel(xp_ref,                         # (N, C)  pooled, time-major rows (batch padded to BP)
                 wih0, bi0, whh0, bhn0,          # layer-0 GRU, gate-fused (in, 3H)
                 wih1, bi1, whh1, bhn1,          # layer-1 GRU, gate-fused
                 w1, b1, w2, b2,                 # fused FC heads
                 out_ref,                        # (N, out_pad)
                 gi0_scr,                        # (N, 3H) hoisted layer-0 input gates
                 hs_scr,                         # (N, H)  layer-1 hidden-state history
                 *, T, BP, H, n_classes):
    f32 = jnp.float32
    x_rows = xp_ref[...]                                         # (N, C)

    # ---- hoisted (non-recurrent) layer-0 input projection, one lane-dense pass ----
    gi0_scr[...] = (jnp.dot(x_rows, wih0[...], preferred_element_type=f32)
                    + bi0[...])                                  # (N, 3H)

    # ---- hoist small recurrent weights / biases out of the loop (vreg-resident) ----
    whh0_v = whh0[...]                                           # (H, 3H)
    wih1_v = wih1[...]                                           # (H, 3H)
    whh1_v = whh1[...]                                           # (H, 3H)
    bhn0_b = jnp.broadcast_to(bhn0[...], (BP, H))                # n-gate hidden bias
    bhn1_b = jnp.broadcast_to(bhn1[...], (BP, H))
    bi1_b = jnp.broadcast_to(bi1[...], (BP, 3 * H))

    def gru_gates(gi, gh, bhn_b, h_prev):
        # PyTorch GRU: r = s(gi_r+gh_r), z = s(gi_z+gh_z),
        #              n = tanh(gi_n + r*(gh_n + b_hn)), h' = (1-z)*n + z*h
        r = jax.nn.sigmoid(gi[:, :H] + gh[:, :H])
        z = jax.nn.sigmoid(gi[:, H:2 * H] + gh[:, H:2 * H])
        n = jnp.tanh(gi[:, 2 * H:] + r * (gh[:, 2 * H:] + bhn_b))
        return (1.0 - z) * n + z * h_prev

    def step(t, carry):
        h0, h1 = carry
        rows = pl.ds(pl.multiple_of(t * BP, BP), BP)             # sublane-aligned
        # layer 0: input projection precomputed above
        gi0 = gi0_scr[rows, :]                                   # (BP, 3H)
        gh0 = jnp.dot(h0, whh0_v, preferred_element_type=f32)    # (BP, 3H)
        h0n = gru_gates(gi0, gh0, bhn0_b, h0)
        # dropout(0.3) between GRU layers is identity at inference
        gi1 = jnp.dot(h0n, wih1_v, preferred_element_type=f32) + bi1_b
        gh1 = jnp.dot(h1, whh1_v, preferred_element_type=f32)
        h1n = gru_gates(gi1, gh1, bhn1_b, h1)
        hs_scr[rows, :] = h1n                                    # aligned full-tile store
        return (h0n, h1n)

    h_init = (jnp.zeros((BP, H), f32), jnp.zeros((BP, H), f32))
    # Serial recurrence: loop-carried vreg hidden states, unrolled for cross-step
    # MXU/EUP overlap (layer-0 of step t+1 is independent of layer-1 of step t).
    jax.lax.fori_loop(0, T, step, h_init, unroll=min(T, 8))

    # ---- fused FC heads over all rows: wide matmul + block-diag matmul ----
    hs = hs_scr[...]                                             # (N, H)
    z1 = jnp.maximum(jnp.dot(hs, w1[...], preferred_element_type=f32) + b1[...], 0.0)
    o = jnp.dot(z1, w2[...], preferred_element_type=f32) + b2[...]
    # columns [0, n_classes) = event logits (identity), rest (x/y/z + pad) = tanh
    col = jax.lax.broadcasted_iota(jnp.int32, o.shape, 1)
    out_ref[...] = jnp.where(col < n_classes, o, jnp.tanh(o))


def seld_decoder_pallas(xp_rows, pk, T, BP, n_classes):
    N, C = xp_rows.shape
    H = pk['whh0'].shape[0]                  # whh0 packed as (H, 3H)
    out_pad = pk['w2'].shape[-1]
    half4 = pk['w1'].shape[-1]

    vmem = pl.BlockSpec(memory_space=pltpu.MemorySpace.VMEM)
    args = (xp_rows,
            pk['wih0'], pk['bi0'], pk['whh0'], pk['bhn0'],
            pk['wih1'], pk['bi1'], pk['whh1'], pk['bhn1'],
            pk['w1'], pk['b1'], pk['w2'], pk['b2'])

    # VMEM residency estimate (lane-padded slabs, x2 slack) -> scoped VMEM limit.
    lane = 128
    row_bytes = 4 * (_round_up(C, lane) + _round_up(3 * H, lane)
                     + _round_up(H, lane) + out_pad)
    vmem_limit = int(min(max(2 * N * row_bytes + (4 << 20), 16 << 20), 64 << 20))

    flops = (2 * N * C * 3 * H                       # hoisted layer-0 projection
             + 18 * T * BP * H * H                   # 3 recurrent (BP,H)@(H,3H) dots / step
             + 2 * N * H * half4                     # fused FC layer 1
             + 2 * N * half4 * out_pad)              # block-diag FC layer 2
    transcendentals = 6 * T * BP * H + N * out_pad
    bytes_accessed = 4 * (N * C + N * out_pad
                          + (C + 2 * H) * 3 * H + H * half4 + half4 * out_pad)

    kernel = functools.partial(_seld_kernel, T=T, BP=BP, H=H, n_classes=n_classes)
    return pl.pallas_call(
        kernel,
        out_shape=jax.ShapeDtypeStruct((N, out_pad), jnp.float32),
        in_specs=[vmem] * len(args),
        out_specs=vmem,
        scratch_shapes=[
            pltpu.VMEM((N, 3 * H), jnp.float32),   # hoisted layer-0 gate slab
            pltpu.VMEM((N, H), jnp.float32),       # layer-1 hidden-state history
        ],
        compiler_params=pltpu.CompilerParams(vmem_limit_bytes=vmem_limit),
        cost_estimate=pl.CostEstimate(flops=int(flops),
                                      transcendentals=int(transcendentals),
                                      bytes_accessed=int(bytes_accessed)),
    )(*args)


# ----------------------------------------------------------------------------
# One-time weight repacking (cached outside the per-call forward).
# Input weights are in PyTorch orientation (out_features, in_features).
# Gate order in packed (in, 3H) columns: [r | z | n].
# ----------------------------------------------------------------------------
def _block_diag(mats):
    rows = sum(m.shape[0] for m in mats)
    cols = sum(m.shape[1] for m in mats)
    out = jnp.zeros((rows, cols), jnp.float32)
    r = c = 0
    for m in mats:
        out = out.at[r:r + m.shape[0], c:c + m.shape[1]].set(m.astype(jnp.float32))
        r += m.shape[0]
        c += m.shape[1]
    return out


def prepare_params(p, n_classes):
    H = p['whh0'].shape[1]
    f32 = jnp.float32

    def pack_w(w):                        # (3H, in) -> (in, 3H), gates [r|z|n]
        return jnp.asarray(w, f32).T

    def pack_bias_i(bih, bhh):            # fold b_hh into b_ih for r/z gates only
        bih = jnp.asarray(bih, f32)
        bhh = jnp.asarray(bhh, f32)
        return jnp.concatenate([bih[:2 * H] + bhh[:2 * H], bih[2 * H:]]
                               ).reshape(1, 3 * H)

    def pack_bias_hn(bhh):                # n-gate hidden bias stays separate
        return jnp.asarray(bhh, f32)[2 * H:].reshape(1, H)

    # fused heads: first layers concatenated, second layers block-diagonal,
    # output padded to a lane-dense multiple of 128 columns.
    w1 = jnp.concatenate([p['we1'].T, p['wx1'].T, p['wy1'].T, p['wz1'].T],
                         axis=1).astype(f32)                      # (H, 4*half)
    b1 = jnp.concatenate([p['be1'], p['bx1'], p['by1'], p['bz1']]
                         ).reshape(1, -1).astype(f32)
    w2 = _block_diag([p['we2'].T, p['wx2'].T, p['wy2'].T, p['wz2'].T])  # (4*half, 4*nc)
    b2 = jnp.concatenate([p['be2'], p['bx2'], p['by2'], p['bz2']]
                         ).reshape(1, -1).astype(f32)

    out_dim = 4 * n_classes
    out_pad = _round_up(out_dim, 128)
    pad = out_pad - out_dim
    w2 = jnp.pad(w2, ((0, 0), (0, pad)))
    b2 = jnp.pad(b2, ((0, 0), (0, pad)))

    return {
        'wih0': pack_w(p['wih0']), 'bi0': pack_bias_i(p['bih0'], p['bhh0']),
        'whh0': pack_w(p['whh0']), 'bhn0': pack_bias_hn(p['bhh0']),
        'wih1': pack_w(p['wih1']), 'bi1': pack_bias_i(p['bih1'], p['bhh1']),
        'whh1': pack_w(p['whh1']), 'bhn1': pack_bias_hn(p['bhh1']),
        'w1': w1, 'b1': b1, 'w2': w2, 'b2': b2,
    }


# ----------------------------------------------------------------------------
# Full SeldDecoder forward.  Non-Pallas work: the freq-average pool fused with
# the time-major row layout + batch padding to a sublane multiple (one small
# XLA pass over x), and the final split/reshape of the result slab.
# ----------------------------------------------------------------------------
@functools.partial(jax.jit, static_argnums=(2,))
def seld_decoder_forward(x_bctf, packed, n_classes):
    B, C, T, F = x_bctf.shape
    BP = _round_up(B, 8)                              # sublane-aligned batch
    # freq_pool='avg' + (T, B, C) layout, fused by XLA into one pass over x.
    xp = jnp.transpose(jnp.mean(x_bctf, axis=3), (2, 0, 1))        # (T, B, C)
    xp = jnp.pad(xp, ((0, 0), (0, BP - B), (0, 0)))                # (T, BP, C)
    xp_rows = jnp.reshape(xp, (T * BP, C))
    out = seld_decoder_pallas(xp_rows, packed, T, BP, n_classes)   # (T*BP, out_pad)
    out = jnp.reshape(out[:, :4 * n_classes], (T, BP, 4 * n_classes))[:, :B, :]
    out = jnp.transpose(out, (1, 0, 2))                            # (B, T, 4*nc)
    return {
        'event_frame_logit': out[..., :n_classes],
        'doa_frame_output': out[..., n_classes:],
    }


# ----------------------------------------------------------------------------
# Deterministic parameter init (shapes from the module's __init__; synthetic).
# Weights are stored in PyTorch orientation (out_features, in_features).
# ----------------------------------------------------------------------------
def init_params(key, n_output_channels, decoder_size, n_classes):
    C, H = n_output_channels, decoder_size
    fc = H
    half = fc // 2
    keys = jax.random.split(key, 32)
    ki = iter(range(32))

    def w(shape, scale=0.1):
        return scale * jax.random.normal(keys[next(ki)], shape, dtype=jnp.float32)

    p = {}
    # 2-layer unidirectional GRU
    p['wih0'] = w((3 * H, C)); p['whh0'] = w((3 * H, H))
    p['bih0'] = w((3 * H,));   p['bhh0'] = w((3 * H,))
    p['wih1'] = w((3 * H, H)); p['whh1'] = w((3 * H, H))
    p['bih1'] = w((3 * H,));   p['bhh1'] = w((3 * H,))
    # FC heads
    for tag in ('e', 'x', 'y', 'z'):
        p[f'w{tag}1'] = w((half, fc));        p[f'b{tag}1'] = w((half,))
        p[f'w{tag}2'] = w((n_classes, half)); p[f'b{tag}2'] = w((n_classes,))
    return p


# ----------------------------------------------------------------------------
# Pure-JAX reference (for correctness verification of the kernel).
# ----------------------------------------------------------------------------
def _reference(x_bctf, p, n_classes):
    xp = jnp.mean(x_bctf, axis=3)                 # (B, C, T)  freq_pool='avg'
    xt = jnp.transpose(xp, (0, 2, 1))             # (B, T, C)
    B, T, C = xt.shape
    H = p['whh0'].shape[1]

    def cell(x_in, h, wih, whh, bih, bhh):
        gi = x_in @ wih.T + bih
        gh = h @ whh.T + bhh
        r = jax.nn.sigmoid(gi[:, :H] + gh[:, :H])
        z = jax.nn.sigmoid(gi[:, H:2 * H] + gh[:, H:2 * H])
        n = jnp.tanh(gi[:, 2 * H:] + r * gh[:, 2 * H:])
        return (1 - z) * n + z * h

    def step(carry, x_in):
        h0, h1 = carry
        h0n = cell(x_in, h0, p['wih0'], p['whh0'], p['bih0'], p['bhh0'])
        h1n = cell(h0n, h1, p['wih1'], p['whh1'], p['bih1'], p['bhh1'])
        return (h0n, h1n), h1n

    (_, _), hs = jax.lax.scan(step, (jnp.zeros((B, H)), jnp.zeros((B, H))),
                              jnp.transpose(xt, (1, 0, 2)))
    h = jnp.transpose(hs, (1, 0, 2))              # (B, T, H)

    def head(w1, b1, w2, b2, act):
        z = jax.nn.relu(h @ w1.T + b1)
        return act(z @ w2.T + b2)

    ev = head(p['we1'], p['be1'], p['we2'], p['be2'], lambda v: v)
    xo = head(p['wx1'], p['bx1'], p['wx2'], p['bx2'], jnp.tanh)
    yo = head(p['wy1'], p['by1'], p['wy2'], p['by2'], jnp.tanh)
    zo = head(p['wz1'], p['bz1'], p['wz2'], p['bz2'], jnp.tanh)
    return ev, jnp.concatenate([xo, yo, zo], axis=-1)


if __name__ == "__main__":
    # x: (batch, n_output_channels, n_timesteps, n_freqs)
    B, C, T, F = 2, 16, 8, 16
    H = 32            # decoder_size
    N_CLASSES = 13

    key = jax.random.PRNGKey(0)
    k_x, k_p = jax.random.split(key)
    x = jax.random.normal(k_x, (B, C, T, F), dtype=jnp.float32)
    params = init_params(k_p, C, H, N_CLASSES)

    # Weight repacking done ONCE per parameter set (not per forward call).
    packed = prepare_params(params, N_CLASSES)
    packed = jax.tree_util.tree_map(jax.block_until_ready, packed)

    out = seld_decoder_forward(x, packed, N_CLASSES)
    out = jax.block_until_ready(out)

    ev_ref, doa_ref = _reference(x, params, N_CLASSES)
    assert out['event_frame_logit'].shape == (B, T, N_CLASSES)
    assert out['doa_frame_output'].shape == (B, T, 3 * N_CLASSES)
    assert jnp.allclose(out['event_frame_logit'], ev_ref, atol=2e-3, rtol=2e-3)
    assert jnp.allclose(out['doa_frame_output'], doa_ref, atol=2e-3, rtol=2e-3)

    print("KERNEL_OK")
</pallas_src>

<mosaic_0001>
module attributes {stable_mosaic.version = 11 : i64} {
  func.func @_seld_kernel(%arg0: memref<64x16xf32, #tpu.memory_space<vmem>>, %arg1: memref<16x96xf32, #tpu.memory_space<vmem>>, %arg2: memref<1x96xf32, #tpu.memory_space<vmem>>, %arg3: memref<32x96xf32, #tpu.memory_space<vmem>>, %arg4: memref<1x32xf32, #tpu.memory_space<vmem>>, %arg5: memref<32x96xf32, #tpu.memory_space<vmem>>, %arg6: memref<1x96xf32, #tpu.memory_space<vmem>>, %arg7: memref<32x96xf32, #tpu.memory_space<vmem>>, %arg8: memref<1x32xf32, #tpu.memory_space<vmem>>, %arg9: memref<32x64xf32, #tpu.memory_space<vmem>>, %arg10: memref<1x64xf32, #tpu.memory_space<vmem>>, %arg11: memref<64x128xf32, #tpu.memory_space<vmem>>, %arg12: memref<1x128xf32, #tpu.memory_space<vmem>>, %arg13: memref<64x128xf32, #tpu.memory_space<vmem>>, %arg14: memref<64x96xf32, #tpu.memory_space<vmem>>, %arg15: memref<64x32xf32, #tpu.memory_space<vmem>>) attributes {dimension_semantics = [], scalar_prefetch = 0 : i64, scratch_operands = 2 : i64, tpu.core_type = #tpu.core_type<tc>} {
    %c0 = arith.constant 0 : index
    %c0_0 = arith.constant 0 : index
    %0 = vector.load %arg0[%c0, %c0_0] : memref<64x16xf32, #tpu.memory_space<vmem>>, vector<64x16xf32>
    %c0_1 = arith.constant 0 : index
    %c0_2 = arith.constant 0 : index
    %1 = vector.load %arg1[%c0_1, %c0_2] : memref<16x96xf32, #tpu.memory_space<vmem>>, vector<16x96xf32>
    %cst = arith.constant dense<0.000000e+00> : vector<64x96xf32>
    %2 = tpu.matmul %0, %1, %cst {dimension_numbers = #tpu.dot_dimension_numbers<[1], [0], [0], [1], [0, 0, 1, 1], [], []>} : vector<64x16xf32>, vector<16x96xf32>, vector<64x96xf32> -> vector<64x96xf32>
    %c0_3 = arith.constant 0 : index
    %c0_4 = arith.constant 0 : index
    %3 = vector.load %arg2[%c0_3, %c0_4] : memref<1x96xf32, #tpu.memory_space<vmem>>, vector<1x96xf32>
    %4 = vector.broadcast %3 : vector<1x96xf32> to vector<64x96xf32>
    %5 = arith.addf %2, %4 : vector<64x96xf32>
    %c0_5 = arith.constant 0 : index
    %c0_6 = arith.constant 0 : index
    %6 = vector.load %arg14[%c0_5, %c0_6] : memref<64x96xf32, #tpu.memory_space<vmem>>, vector<64x96xf32>
    tpu.vector_store %arg14[%c0_5, %c0_6], %5 {strides = array<i32>} : memref<64x96xf32, #tpu.memory_space<vmem>>, vector<64x96xf32>,
    %c0_7 = arith.constant 0 : index
    %c0_8 = arith.constant 0 : index
    %7 = vector.load %arg3[%c0_7, %c0_8] : memref<32x96xf32, #tpu.memory_space<vmem>>, vector<32x96xf32>
    %c0_9 = arith.constant 0 : index
    %c0_10 = arith.constant 0 : index
    %8 = vector.load %arg5[%c0_9, %c0_10] : memref<32x96xf32, #tpu.memory_space<vmem>>, vector<32x96xf32>
    %c0_11 = arith.constant 0 : index
    %c0_12 = arith.constant 0 : index
    %9 = vector.load %arg7[%c0_11, %c0_12] : memref<32x96xf32, #tpu.memory_space<vmem>>, vector<32x96xf32>
    %c0_13 = arith.constant 0 : index
    %c0_14 = arith.constant 0 : index
    %10 = vector.load %arg4[%c0_13, %c0_14] : memref<1x32xf32, #tpu.memory_space<vmem>>, vector<1x32xf32>
    %11 = vector.shape_cast %10 : vector<1x32xf32> to vector<1x32xf32>
    %12 = vector.broadcast %11 : vector<1x32xf32> to vector<8x32xf32>
    %c0_15 = arith.constant 0 : index
    %c0_16 = arith.constant 0 : index
    %13 = vector.load %arg8[%c0_15, %c0_16] : memref<1x32xf32, #tpu.memory_space<vmem>>, vector<1x32xf32>
    %14 = vector.shape_cast %13 : vector<1x32xf32> to vector<1x32xf32>
    %15 = vector.broadcast %14 : vector<1x32xf32> to vector<8x32xf32>
    %c0_17 = arith.constant 0 : index
    %c0_18 = arith.constant 0 : index
    %16 = vector.load %arg6[%c0_17, %c0_18] : memref<1x96xf32, #tpu.memory_space<vmem>>, vector<1x96xf32>
    %17 = vector.shape_cast %16 : vector<1x96xf32> to vector<1x96xf32>
    %18 = vector.broadcast %17 : vector<1x96xf32> to vector<8x96xf32>
    %cst_19 = arith.constant 0.000000e+00 : f32
    %19 = vector.broadcast %cst_19 : f32 to vector<8x32xf32>
    %cst_20 = arith.constant 0.000000e+00 : f32
    %20 = vector.broadcast %cst_20 : f32 to vector<8x32xf32>
    %c0_i32 = arith.constant 0 : i32
    %c8_i32 = arith.constant 8 : i32
    %21 = arith.muli %c0_i32, %c8_i32 : i32
    %22 = tpu.assume_multiple %21, 8 : i32
    %23 = arith.index_cast %22 : i32 to index
    %c0_21 = arith.constant 0 : index
    %24 = vector.load %arg14[%23, %c0_21] : memref<64x96xf32, #tpu.memory_space<vmem>>, vector<8x96xf32>
    %cst_22 = arith.constant dense<0.000000e+00> : vector<8x96xf32>
    %25 = tpu.matmul %19, %7, %cst_22 {dimension_numbers = #tpu.dot_dimension_numbers<[1], [0], [0], [1], [0, 0, 1, 1], [], []>} : vector<8x32xf32>, vector<32x96xf32>, vector<8x96xf32> -> vector<8x96xf32>
    %26 = vector.extract_strided_slice %24 {offsets = [0, 0], sizes = [8, 32], strides = [1, 1]} : vector<8x96xf32> to vector<8x32xf32>
    %27 = vector.extract_strided_slice %25 {offsets = [0, 0], sizes = [8, 32], strides = [1, 1]} : vector<8x96xf32> to vector<8x32xf32>
    %28 = arith.addf %26, %27 : vector<8x32xf32>
    %29 = arith.negf %28 : vector<8x32xf32>
    %30 = math.exp %29 : vector<8x32xf32>
    %cst_23 = arith.constant 1.000000e+00 : f32
    %31 = vector.broadcast %cst_23 : f32 to vector<8x32xf32>
    %32 = arith.addf %31, %30 : vector<8x32xf32>
    %33 = arith.divf %31, %32 : vector<8x32xf32>
    %34 = vector.extract_strided_slice %24 {offsets = [0, 32], sizes = [8, 32], strides = [1, 1]} : vector<8x96xf32> to vector<8x32xf32>
    %35 = vector.extract_strided_slice %25 {offsets = [0, 32], sizes = [8, 32], strides = [1, 1]} : vector<8x96xf32> to vector<8x32xf32>
    %36 = arith.addf %34, %35 : vector<8x32xf32>
    %37 = arith.negf %36 : vector<8x32xf32>
    %38 = math.exp %37 : vector<8x32xf32>
    %cst_24 = arith.constant 1.000000e+00 : f32
    %39 = vector.broadcast %cst_24 : f32 to vector<8x32xf32>
    %40 = arith.addf %39, %38 : vector<8x32xf32>
    %41 = arith.divf %39, %40 : vector<8x32xf32>
    %42 = vector.extract_strided_slice %24 {offsets = [0, 64], sizes = [8, 32], strides = [1, 1]} : vector<8x96xf32> to vector<8x32xf32>
    %43 = vector.extract_strided_slice %25 {offsets = [0, 64], sizes = [8, 32], strides = [1, 1]} : vector<8x96xf32> to vector<8x32xf32>
    %44 = arith.addf %43, %12 : vector<8x32xf32>
    %45 = arith.mulf %33, %44 : vector<8x32xf32>
    %46 = arith.addf %42, %45 : vector<8x32xf32>
    %47 = math.tanh %46 : vector<8x32xf32>
    %cst_25 = arith.constant 1.000000e+00 : f32
    %48 = vector.broadcast %cst_25 : f32 to vector<8x32xf32>
    %49 = arith.subf %48, %41 : vector<8x32xf32>
    %50 = arith.mulf %49, %47 : vector<8x32xf32>
    %51 = arith.mulf %41, %19 : vector<8x32xf32>
    %52 = arith.addf %50, %51 : vector<8x32xf32>
    %cst_26 = arith.constant dense<0.000000e+00> : vector<8x96xf32>
    %53 = tpu.matmul %52, %8, %cst_26 {dimension_numbers = #tpu.dot_dimension_numbers<[1], [0], [0], [1], [0, 0, 1, 1], [], []>} : vector<8x32xf32>, vector<32x96xf32>, vector<8x96xf32> -> vector<8x96xf32>
    %54 = arith.addf %53, %18 : vector<8x96xf32>
    %cst_27 = arith.constant dense<0.000000e+00> : vector<8x96xf32>
    %55 = tpu.matmul %20, %9, %cst_27 {dimension_numbers = #tpu.dot_dimension_numbers<[1], [0], [0], [1], [0, 0, 1, 1], [], []>} : vector<8x32xf32>, vector<32x96xf32>, vector<8x96xf32> -> vector<8x96xf32>
    %56 = vector.extract_strided_slice %54 {offsets = [0, 0], sizes = [8, 32], strides = [1, 1]} : vector<8x96xf32> to vector<8x32xf32>
    %57 = vector.extract_strided_slice %55 {offsets = [0, 0], sizes = [8, 32], strides = [1, 1]} : vector<8x96xf32> to vector<8x32xf32>
    %58 = arith.addf %56, %57 : vector<8x32xf32>
    %59 = arith.negf %58 : vector<8x32xf32>
    %60 = math.exp %59 : vector<8x32xf32>
    %cst_28 = arith.constant 1.000000e+00 : f32
    %61 = vector.broadcast %cst_28 : f32 to vector<8x32xf32>
    %62 = arith.addf %61, %60 : vector<8x32xf32>
    %63 = arith.divf %61, %62 : vector<8x32xf32>
    %64 = vector.extract_strided_slice %54 {offsets = [0, 32], sizes = [8, 32], strides = [1, 1]} : vector<8x96xf32> to vector<8x32xf32>
    %65 = vector.extract_strided_slice %55 {offsets = [0, 32], sizes = [8, 32], strides = [1, 1]} : vector<8x96xf32> to vector<8x32xf32>
    %66 = arith.addf %64, %65 : vector<8x32xf32>
    %67 = arith.negf %66 : vector<8x32xf32>
    %68 = math.exp %67 : vector<8x32xf32>
    %cst_29 = arith.constant 1.000000e+00 : f32
    %69 = vector.broadcast %cst_29 : f32 to vector<8x32xf32>
    %70 = arith.addf %69, %68 : vector<8x32xf32>
    %71 = arith.divf %69, %70 : vector<8x32xf32>
    %72 = vector.extract_strided_slice %54 {offsets = [0, 64], sizes = [8, 32], strides = [1, 1]} : vector<8x96xf32> to vector<8x32xf32>
    %73 = vector.extract_strided_slice %55 {offsets = [0, 64], sizes = [8, 32], strides = [1, 1]} : vector<8x96xf32> to vector<8x32xf32>
    %74 = arith.addf %73, %15 : vector<8x32xf32>
    %75 = arith.mulf %63, %74 : vector<8x32xf32>
    %76 = arith.addf %72, %75 : vector<8x32xf32>
    %77 = math.tanh %76 : vector<8x32xf32>
    %cst_30 = arith.constant 1.000000e+00 : f32
    %78 = vector.broadcast %cst_30 : f32 to vector<8x32xf32>
    %79 = arith.subf %78, %71 : vector<8x32xf32>
    %80 = arith.mulf %79, %77 : vector<8x32xf32>
    %81 = arith.mulf %71, %20 : vector<8x32xf32>
    %82 = arith.addf %80, %81 : vector<8x32xf32>
    %83 = arith.index_cast %22 : i32 to index
    %c0_31 = arith.constant 0 : index
    %84 = vector.load %arg15[%83, %c0_31] : memref<64x32xf32, #tpu.memory_space<vmem>>, vector<8x32xf32>
    tpu.vector_store %arg15[%83, %c0_31], %82 {strides = array<i32>} : memref<64x32xf32, #tpu.memory_space<vmem>>, vector<8x32xf32>,
    %c1_i32 = arith.constant 1 : i32
    %c8_i32_32 = arith.constant 8 : i32
    %85 = arith.muli %c1_i32, %c8_i32_32 : i32
    %86 = tpu.assume_multiple %85, 8 : i32
    %87 = arith.index_cast %86 : i32 to index
    %c0_33 = arith.constant 0 : index
    %88 = vector.load %arg14[%87, %c0_33] : memref<64x96xf32, #tpu.memory_space<vmem>>, vector<8x96xf32>
    %cst_34 = arith.constant dense<0.000000e+00> : vector<8x96xf32>
    %89 = tpu.matmul %52, %7, %cst_34 {dimension_numbers = #tpu.dot_dimension_numbers<[1], [0], [0], [1], [0, 0, 1, 1], [], []>} : vector<8x32xf32>, vector<32x96xf32>, vector<8x96xf32> -> vector<8x96xf32>
    %90 = vector.extract_strided_slice %88 {offsets = [0, 0], sizes = [8, 32], strides = [1, 1]} : vector<8x96xf32> to vector<8x32xf32>
    %91 = vector.extract_strided_slice %89 {offsets = [0, 0], sizes = [8, 32], strides = [1, 1]} : vector<8x96xf32> to vector<8x32xf32>
    %92 = arith.addf %90, %91 : vector<8x32xf32>
    %93 = arith.negf %92 : vector<8x32xf32>
    %94 = math.exp %93 : vector<8x32xf32>
    %cst_35 = arith.constant 1.000000e+00 : f32
    %95 = vector.broadcast %cst_35 : f32 to vector<8x32xf32>
    %96 = arith.addf %95, %94 : vector<8x32xf32>
    %97 = arith.divf %95, %96 : vector<8x32xf32>
    %98 = vector.extract_strided_slice %88 {offsets = [0, 32], sizes = [8, 32], strides = [1, 1]} : vector<8x96xf32> to vector<8x32xf32>
    %99 = vector.extract_strided_slice %89 {offsets = [0, 32], sizes = [8, 32], strides = [1, 1]} : vector<8x96xf32> to vector<8x32xf32>
    %100 = arith.addf %98, %99 : vector<8x32xf32>
    %101 = arith.negf %100 : vector<8x32xf32>
    %102 = math.exp %101 : vector<8x32xf32>
    %cst_36 = arith.constant 1.000000e+00 : f32
    %103 = vector.broadcast %cst_36 : f32 to vector<8x32xf32>
    %104 = arith.addf %103, %102 : vector<8x32xf32>
    %105 = arith.divf %103, %104 : vector<8x32xf32>
    %106 = vector.extract_strided_slice %88 {offsets = [0, 64], sizes = [8, 32], strides = [1, 1]} : vector<8x96xf32> to vector<8x32xf32>
    %107 = vector.extract_strided_slice %89 {offsets = [0, 64], sizes = [8, 32], strides = [1, 1]} : vector<8x96xf32> to vector<8x32xf32>
    %108 = arith.addf %107, %12 : vector<8x32xf32>
    %109 = arith.mulf %97, %108 : vector<8x32xf32>
    %110 = arith.addf %106, %109 : vector<8x32xf32>
    %111 = math.tanh %110 : vector<8x32xf32>
    %cst_37 = arith.constant 1.000000e+00 : f32
    %112 = vector.broadcast %cst_37 : f32 to vector<8x32xf32>
    %113 = arith.subf %112, %105 : vector<8x32xf32>
    %114 = arith.mulf %113, %111 : vector<8x32xf32>
    %115 = arith.mulf %105, %52 : vector<8x32xf32>
    %116 = arith.addf %114, %115 : vector<8x32xf32>
    %cst_38 = arith.constant dense<0.000000e+00> : vector<8x96xf32>
    %117 = tpu.matmul %116, %8, %cst_38 {dimension_numbers = #tpu.dot_dimension_numbers<[1], [0], [0], [1], [0, 0, 1, 1], [], []>} : vector<8x32xf32>, vector<32x96xf32>, vector<8x96xf32> -> vector<8x96xf32>
    %118 = arith.addf %117, %18 : vector<8x96xf32>
    %cst_39 = arith.constant dense<0.000000e+00> : vector<8x96xf32>
    %119 = tpu.matmul %82, %9, %cst_39 {dimension_numbers = #tpu.dot_dimension_numbers<[1], [0], [0], [1], [0, 0, 1, 1], [], []>} : vector<8x32xf32>, vector<32x96xf32>, vector<8x96xf32> -> vector<8x96xf32>
    %120 = vector.extract_strided_slice %118 {offsets = [0, 0], sizes = [8, 32], strides = [1, 1]} : vector<8x96xf32> to vector<8x32xf32>
    %121 = vector.extract_strided_slice %119 {offsets = [0, 0], sizes = [8, 32], strides = [1, 1]} : vector<8x96xf32> to vector<8x32xf32>
    %122 = arith.addf %120, %121 : vector<8x32xf32>
    %123 = arith.negf %122 : vector<8x32xf32>
    %124 = math.exp %123 : vector<8x32xf32>
    %cst_40 = arith.constant 1.000000e+00 : f32
    %125 = vector.broadcast %cst_40 : f32 to vector<8x32xf32>
    %126 = arith.addf %125, %124 : vector<8x32xf32>
    %127 = arith.divf %125, %126 : vector<8x32xf32>
    %128 = vector.extract_strided_slice %118 {offsets = [0, 32], sizes = [8, 32], strides = [1, 1]} : vector<8x96xf32> to vector<8x32xf32>
    %129 = vector.extract_strided_slice %119 {offsets = [0, 32], sizes = [8, 32], strides = [1, 1]} : vector<8x96xf32> to vector<8x32xf32>
    %130 = arith.addf %128, %129 : vector<8x32xf32>
    %131 = arith.negf %130 : vector<8x32xf32>
    %132 = math.exp %131 : vector<8x32xf32>
    %cst_41 = arith.constant 1.000000e+00 : f32
    %133 = vector.broadcast %cst_41 : f32 to vector<8x32xf32>
    %134 = arith.addf %133, %132 : vector<8x32xf32>
    %135 = arith.divf %133, %134 : vector<8x32xf32>
    %136 = vector.extract_strided_slice %118 {offsets = [0, 64], sizes = [8, 32], strides = [1, 1]} : vector<8x96xf32> to vector<8x32xf32>
    %137 = vector.extract_strided_slice %119 {offsets = [0, 64], sizes = [8, 32], strides = [1, 1]} : vector<8x96xf32> to vector<8x32xf32>
    %138 = arith.addf %137, %15 : vector<8x32xf32>
    %139 = arith.mulf %127, %138 : vector<8x32xf32>
    %140 = arith.addf %136, %139 : vector<8x32xf32>
    %141 = math.tanh %140 : vector<8x32xf32>
    %cst_42 = arith.constant 1.000000e+00 : f32
    %142 = vector.broadcast %cst_42 : f32 to vector<8x32xf32>
    %143 = arith.subf %142, %135 : vector<8x32xf32>
    %144 = arith.mulf %143, %141 : vector<8x32xf32>
    %145 = arith.mulf %135, %82 : vector<8x32xf32>
    %146 = arith.addf %144, %145 : vector<8x32xf32>
    %147 = arith.index_cast %86 : i32 to index
    %c0_43 = arith.constant 0 : index
    %148 = vector.load %arg15[%147, %c0_43] : memref<64x32xf32, #tpu.memory_space<vmem>>, vector<8x32xf32>
    tpu.vector_store %arg15[%147, %c0_43], %146 {strides = array<i32>} : memref<64x32xf32, #tpu.memory_space<vmem>>, vector<8x32xf32>,
    %c2_i32 = arith.constant 2 : i32
    %c8_i32_44 = arith.constant 8 : i32
    %149 = arith.muli %c2_i32, %c8_i32_44 : i32
    %150 = tpu.assume_multiple %149, 8 : i32
    %151 = arith.index_cast %150 : i32 to index
    %c0_45 = arith.constant 0 : index
    %152 = vector.load %arg14[%151, %c0_45] : memref<64x96xf32, #tpu.memory_space<vmem>>, vector<8x96xf32>
    %cst_46 = arith.constant dense<0.000000e+00> : vector<8x96xf32>
    %153 = tpu.matmul %116, %7, %cst_46 {dimension_numbers = #tpu.dot_dimension_numbers<[1], [0], [0], [1], [0, 0, 1, 1], [], []>} : vector<8x32xf32>, vector<32x96xf32>, vector<8x96xf32> -> vector<8x96xf32>
    %154 = vector.extract_strided_slice %152 {offsets = [0, 0], sizes = [8, 32], strides = [1, 1]} : vector<8x96xf32> to vector<8x32xf32>
    %155 = vector.extract_strided_slice %153 {offsets = [0, 0], sizes = [8, 32], strides = [1, 1]} : vector<8x96xf32> to vector<8x32xf32>
    %156 = arith.addf %154, %155 : vector<8x32xf32>
    %157 = arith.negf %156 : vector<8x32xf32>
    %158 = math.exp %157 : vector<8x32xf32>
    %cst_47 = arith.constant 1.000000e+00 : f32
    %159 = vector.broadcast %cst_47 : f32 to vector<8x32xf32>
    %160 = arith.addf %159, %158 : vector<8x32xf32>
    %161 = arith.divf %159, %160 : vector<8x32xf32>
    %162 = vector.extract_strided_slice %152 {offsets = [0, 32], sizes = [8, 32], strides = [1, 1]} : vector<8x96xf32> to vector<8x32xf32>
    %163 = vector.extract_strided_slice %153 {offsets = [0, 32], sizes = [8, 32], strides = [1, 1]} : vector<8x96xf32> to vector<8x32xf32>
    %164 = arith.addf %162, %163 : vector<8x32xf32>
    %165 = arith.negf %164 : vector<8x32xf32>
    %166 = math.exp %165 : vector<8x32xf32>
    %cst_48 = arith.constant 1.000000e+00 : f32
    %167 = vector.broadcast %cst_48 : f32 to vector<8x32xf32>
    %168 = arith.addf %167, %166 : vector<8x32xf32>
    %169 = arith.divf %167, %168 : vector<8x32xf32>
    %170 = vector.extract_strided_slice %152 {offsets = [0, 64], sizes = [8, 32], strides = [1, 1]} : vector<8x96xf32> to vector<8x32xf32>
    %171 = vector.extract_strided_slice %153 {offsets = [0, 64], sizes = [8, 32], strides = [1, 1]} : vector<8x96xf32> to vector<8x32xf32>
    %172 = arith.addf %171, %12 : vector<8x32xf32>
    %173 = arith.mulf %161, %172 : vector<8x32xf32>
    %174 = arith.addf %170, %173 : vector<8x32xf32>
    %175 = math.tanh %174 : vector<8x32xf32>
    %cst_49 = arith.constant 1.000000e+00 : f32
    %176 = vector.broadcast %cst_49 : f32 to vector<8x32xf32>
    %177 = arith.subf %176, %169 : vector<8x32xf32>
    %178 = arith.mulf %177, %175 : vector<8x32xf32>
    %179 = arith.mulf %169, %116 : vector<8x32xf32>
    %180 = arith.addf %178, %179 : vector<8x32xf32>
    %cst_50 = arith.constant dense<0.000000e+00> : vector<8x96xf32>
    %181 = tpu.matmul %180, %8, %cst_50 {dimension_numbers = #tpu.dot_dimension_numbers<[1], [0], [0], [1], [0, 0, 1, 1], [], []>} : vector<8x32xf32>, vector<32x96xf32>, vector<8x96xf32> -> vector<8x96xf32>
    %182 = arith.addf %181, %18 : vector<8x96xf32>
    %cst_51 = arith.constant dense<0.000000e+00> : vector<8x96xf32>
    %183 = tpu.matmul %146, %9, %cst_51 {dimension_numbers = #tpu.dot_dimension_numbers<[1], [0], [0], [1], [0, 0, 1, 1], [], []>} : vector<8x32xf32>, vector<32x96xf32>, vector<8x96xf32> -> vector<8x96xf32>
    %184 = vector.extract_strided_slice %182 {offsets = [0, 0], sizes = [8, 32], strides = [1, 1]} : vector<8x96xf32> to vector<8x32xf32>
    %185 = vector.extract_strided_slice %183 {offsets = [0, 0], sizes = [8, 32], strides = [1, 1]} : vector<8x96xf32> to vector<8x32xf32>
    %186 = arith.addf %184, %185 : vector<8x32xf32>
    %187 = arith.negf %186 : vector<8x32xf32>
    %188 = math.exp %187 : vector<8x32xf32>
    %cst_52 = arith.constant 1.000000e+00 : f32
    %189 = vector.broadcast %cst_52 : f32 to vector<8x32xf32>
    %190 = arith.addf %189, %188 : vector<8x32xf32>
    %191 = arith.divf %189, %190 : vector<8x32xf32>
    %192 = vector.extract_strided_slice %182 {offsets = [0, 32], sizes = [8, 32], strides = [1, 1]} : vector<8x96xf32> to vector<8x32xf32>
    %193 = vector.extract_strided_slice %183 {offsets = [0, 32], sizes = [8, 32], strides = [1, 1]} : vector<8x96xf32> to vector<8x32xf32>
    %194 = arith.addf %192, %193 : vector<8x32xf32>
    %195 = arith.negf %194 : vector<8x32xf32>
    %196 = math.exp %195 : vector<8x32xf32>
    %cst_53 = arith.constant 1.000000e+00 : f32
    %197 = vector.broadcast %cst_53 : f32 to vector<8x32xf32>
    %198 = arith.addf %197, %196 : vector<8x32xf32>
    %199 = arith.divf %197, %198 : vector<8x32xf32>
    %200 = vector.extract_strided_slice %182 {offsets = [0, 64], sizes = [8, 32], strides = [1, 1]} : vector<8x96xf32> to vector<8x32xf32>
    %201 = vector.extract_strided_slice %183 {offsets = [0, 64], sizes = [8, 32], strides = [1, 1]} : vector<8x96xf32> to vector<8x32xf32>
    %202 = arith.addf %201, %15 : vector<8x32xf32>
    %203 = arith.mulf %191, %202 : vector<8x32xf32>
    %204 = arith.addf %200, %203 : vector<8x32xf32>
    %205 = math.tanh %204 : vector<8x32xf32>
    %cst_54 = arith.constant 1.000000e+00 : f32
    %206 = vector.broadcast %cst_54 : f32 to vector<8x32xf32>
    %207 = arith.subf %206, %199 : vector<8x32xf32>
    %208 = arith.mulf %207, %205 : vector<8x32xf32>
    %209 = arith.mulf %199, %146 : vector<8x32xf32>
    %210 = arith.addf %208, %209 : vector<8x32xf32>
    %211 = arith.index_cast %150 : i32 to index
    %c0_55 = arith.constant 0 : index
    %212 = vector.load %arg15[%211, %c0_55] : memref<64x32xf32, #tpu.memory_space<vmem>>, vector<8x32xf32>
    tpu.vector_store %arg15[%211, %c0_55], %210 {strides = array<i32>} : memref<64x32xf32, #tpu.memory_space<vmem>>, vector<8x32xf32>,
    %c3_i32 = arith.constant 3 : i32
    %c8_i32_56 = arith.constant 8 : i32
    %213 = arith.muli %c3_i32, %c8_i32_56 : i32
    %214 = tpu.assume_multiple %213, 8 : i32
    %215 = arith.index_cast %214 : i32 to index
    %c0_57 = arith.constant 0 : index
    %216 = vector.load %arg14[%215, %c0_57] : memref<64x96xf32, #tpu.memory_space<vmem>>, vector<8x96xf32>
    %cst_58 = arith.constant dense<0.000000e+00> : vector<8x96xf32>
    %217 = tpu.matmul %180, %7, %cst_58 {dimension_numbers = #tpu.dot_dimension_numbers<[1], [0], [0], [1], [0, 0, 1, 1], [], []>} : vector<8x32xf32>, vector<32x96xf32>, vector<8x96xf32> -> vector<8x96xf32>
    %218 = vector.extract_strided_slice %216 {offsets = [0, 0], sizes = [8, 32], strides = [1, 1]} : vector<8x96xf32> to vector<8x32xf32>
    %219 = vector.extract_strided_slice %217 {offsets = [0, 0], sizes = [8, 32], strides = [1, 1]} : vector<8x96xf32> to vector<8x32xf32>
    %220 = arith.addf %218, %219 : vector<8x32xf32>
    %221 = arith.negf %220 : vector<8x32xf32>
    %222 = math.exp %221 : vector<8x32xf32>
    %cst_59 = arith.constant 1.000000e+00 : f32
    %223 = vector.broadcast %cst_59 : f32 to vector<8x32xf32>
    %224 = arith.addf %223, %222 : vector<8x32xf32>
    %225 = arith.divf %223, %224 : vector<8x32xf32>
    %226 = vector.extract_strided_slice %216 {offsets = [0, 32], sizes = [8, 32], strides = [1, 1]} : vector<8x96xf32> to vector<8x32xf32>
    %227 = vector.extract_strided_slice %217 {offsets = [0, 32], sizes = [8, 32], strides = [1, 1]} : vector<8x96xf32> to vector<8x32xf32>
    %228 = arith.addf %226, %227 : vector<8x32xf32>
    %229 = arith.negf %228 : vector<8x32xf32>
    %230 = math.exp %229 : vector<8x32xf32>
    %cst_60 = arith.constant 1.000000e+00 : f32
    %231 = vector.broadcast %cst_60 : f32 to vector<8x32xf32>
    %232 = arith.addf %231, %230 : vector<8x32xf32>
    %233 = arith.divf %231, %232 : vector<8x32xf32>
    %234 = vector.extract_strided_slice %216 {offsets = [0, 64], sizes = [8, 32], strides = [1, 1]} : vector<8x96xf32> to vector<8x32xf32>
    %235 = vector.extract_strided_slice %217 {offsets = [0, 64], sizes = [8, 32], strides = [1, 1]} : vector<8x96xf32> to vector<8x32xf32>
    %236 = arith.addf %235, %12 : vector<8x32xf32>
    %237 = arith.mulf %225, %236 : vector<8x32xf32>
    %238 = arith.addf %234, %237 : vector<8x32xf32>
    %239 = math.tanh %238 : vector<8x32xf32>
    %cst_61 = arith.constant 1.000000e+00 : f32
    %240 = vector.broadcast %cst_61 : f32 to vector<8x32xf32>
    %241 = arith.subf %240, %233 : vector<8x32xf32>
    %242 = arith.mulf %241, %239 : vector<8x32xf32>
    %243 = arith.mulf %233, %180 : vector<8x32xf32>
    %244 = arith.addf %242, %243 : vector<8x32xf32>
    %cst_62 = arith.constant dense<0.000000e+00> : vector<8x96xf32>
    %245 = tpu.matmul %244, %8, %cst_62 {dimension_numbers = #tpu.dot_dimension_numbers<[1], [0], [0], [1], [0, 0, 1, 1], [], []>} : vector<8x32xf32>, vector<32x96xf32>, vector<8x96xf32> -> vector<8x96xf32>
    %246 = arith.addf %245, %18 : vector<8x96xf32>
    %cst_63 = arith.constant dense<0.000000e+00> : vector<8x96xf32>
    %247 = tpu.matmul %210, %9, %cst_63 {dimension_numbers = #tpu.dot_dimension_numbers<[1], [0], [0], [1], [0, 0, 1, 1], [], []>} : vector<8x32xf32>, vector<32x96xf32>, vector<8x96xf32> -> vector<8x96xf32>
    %248 = vector.extract_strided_slice %246 {offsets = [0, 0], sizes = [8, 32], strides = [1, 1]} : vector<8x96xf32> to vector<8x32xf32>
    %249 = vector.extract_strided_slice %247 {offsets = [0, 0], sizes = [8, 32], strides = [1, 1]} : vector<8x96xf32> to vector<8x32xf32>
    %250 = arith.addf %248, %249 : vector<8x32xf32>
    %251 = arith.negf %250 : vector<8x32xf32>
    %252 = math.exp %251 : vector<8x32xf32>
    %cst_64 = arith.constant 1.000000e+00 : f32
    %253 = vector.broadcast %cst_64 : f32 to vector<8x32xf32>
    %254 = arith.addf %253, %252 : vector<8x32xf32>
    %255 = arith.divf %253, %254 : vector<8x32xf32>
    %256 = vector.extract_strided_slice %246 {offsets = [0, 32], sizes = [8, 32], strides = [1, 1]} : vector<8x96xf32> to vector<8x32xf32>
    %257 = vector.extract_strided_slice %247 {offsets = [0, 32], sizes = [8, 32], strides = [1, 1]} : vector<8x96xf32> to vector<8x32xf32>
    %258 = arith.addf %256, %257 : vector<8x32xf32>
    %259 = arith.negf %258 : vector<8x32xf32>
    %260 = math.exp %259 : vector<8x32xf32>
    %cst_65 = arith.constant 1.000000e+00 : f32
    %261 = vector.broadcast %cst_65 : f32 to vector<8x32xf32>
    %262 = arith.addf %261, %260 : vector<8x32xf32>
    %263 = arith.divf %261, %262 : vector<8x32xf32>
    %264 = vector.extract_strided_slice %246 {offsets = [0, 64], sizes = [8, 32], strides = [1, 1]} : vector<8x96xf32> to vector<8x32xf32>
    %265 = vector.extract_strided_slice %247 {offsets = [0, 64], sizes = [8, 32], strides = [1, 1]} : vector<8x96xf32> to vector<8x32xf32>
    %266 = arith.addf %265, %15 : vector<8x32xf32>
    %267 = arith.mulf %255, %266 : vector<8x32xf32>
    %268 = arith.addf %264, %267 : vector<8x32xf32>
    %269 = math.tanh %268 : vector<8x32xf32>
    %cst_66 = arith.constant 1.000000e+00 : f32
    %270 = vector.broadcast %cst_66 : f32 to vector<8x32xf32>
    %271 = arith.subf %270, %263 : vector<8x32xf32>
    %272 = arith.mulf %271, %269 : vector<8x32xf32>
    %273 = arith.mulf %263, %210 : vector<8x32xf32>
    %274 = arith.addf %272, %273 : vector<8x32xf32>
    %275 = arith.index_cast %214 : i32 to index
    %c0_67 = arith.constant 0 : index
    %276 = vector.load %arg15[%275, %c0_67] : memref<64x32xf32, #tpu.memory_space<vmem>>, vector<8x32xf32>
    tpu.vector_store %arg15[%275, %c0_67], %274 {strides = array<i32>} : memref<64x32xf32, #tpu.memory_space<vmem>>, vector<8x32xf32>,
    %c4_i32 = arith.constant 4 : i32
    %c8_i32_68 = arith.constant 8 : i32
    %277 = arith.muli %c4_i32, %c8_i32_68 : i32
    %278 = tpu.assume_multiple %277, 8 : i32
    %279 = arith.index_cast %278 : i32 to index
    %c0_69 = arith.constant 0 : index
    %280 = vector.load %arg14[%279, %c0_69] : memref<64x96xf32, #tpu.memory_space<vmem>>, vector<8x96xf32>
    %cst_70 = arith.constant dense<0.000000e+00> : vector<8x96xf32>
    %281 = tpu.matmul %244, %7, %cst_70 {dimension_numbers = #tpu.dot_dimension_numbers<[1], [0], [0], [1], [0, 0, 1, 1], [], []>} : vector<8x32xf32>, vector<32x96xf32>, vector<8x96xf32> -> vector<8x96xf32>
    %282 = vector.extract_strided_slice %280 {offsets = [0, 0], sizes = [8, 32], strides = [1, 1]} : vector<8x96xf32> to vector<8x32xf32>
    %283 = vector.extract_strided_slice %281 {offsets = [0, 0], sizes = [8, 32], strides = [1, 1]} : vector<8x96xf32> to vector<8x32xf32>
    %284 = arith.addf %282, %283 : vector<8x32xf32>
    %285 = arith.negf %284 : vector<8x32xf32>
    %286 = math.exp %285 : vector<8x32xf32>
    %cst_71 = arith.constant 1.000000e+00 : f32
    %287 = vector.broadcast %cst_71 : f32 to vector<8x32xf32>
    %288 = arith.addf %287, %286 : vector<8x32xf32>
    %289 = arith.divf %287, %288 : vector<8x32xf32>
    %290 = vector.extract_strided_slice %280 {offsets = [0, 32], sizes = [8, 32], strides = [1, 1]} : vector<8x96xf32> to vector<8x32xf32>
    %291 = vector.extract_strided_slice %281 {offsets = [0, 32], sizes = [8, 32], strides = [1, 1]} : vector<8x96xf32> to vector<8x32xf32>
    %292 = arith.addf %290, %291 : vector<8x32xf32>
    %293 = arith.negf %292 : vector<8x32xf32>
    %294 = math.exp %293 : vector<8x32xf32>
    %cst_72 = arith.constant 1.000000e+00 : f32
    %295 = vector.broadcast %cst_72 : f32 to vector<8x32xf32>
    %296 = arith.addf %295, %294 : vector<8x32xf32>
    %297 = arith.divf %295, %296 : vector<8x32xf32>
    %298 = vector.extract_strided_slice %280 {offsets = [0, 64], sizes = [8, 32], strides = [1, 1]} : vector<8x96xf32> to vector<8x32xf32>
    %299 = vector.extract_strided_slice %281 {offsets = [0, 64], sizes = [8, 32], strides = [1, 1]} : vector<8x96xf32> to vector<8x32xf32>
    %300 = arith.addf %299, %12 : vector<8x32xf32>
    %301 = arith.mulf %289, %300 : vector<8x32xf32>
    %302 = arith.addf %298, %301 : vector<8x32xf32>
    %303 = math.tanh %302 : vector<8x32xf32>
    %cst_73 = arith.constant 1.000000e+00 : f32
    %304 = vector.broadcast %cst_73 : f32 to vector<8x32xf32>
    %305 = arith.subf %304, %297 : vector<8x32xf32>
    %306 = arith.mulf %305, %303 : vector<8x32xf32>
    %307 = arith.mulf %297, %244 : vector<8x32xf32>
    %308 = arith.addf %306, %307 : vector<8x32xf32>
    %cst_74 = arith.constant dense<0.000000e+00> : vector<8x96xf32>
    %309 = tpu.matmul %308, %8, %cst_74 {dimension_numbers = #tpu.dot_dimension_numbers<[1], [0], [0], [1], [0, 0, 1, 1], [], []>} : vector<8x32xf32>, vector<32x96xf32>, vector<8x96xf32> -> vector<8x96xf32>
    %310 = arith.addf %309, %18 : vector<8x96xf32>
    %cst_75 = arith.constant dense<0.000000e+00> : vector<8x96xf32>
    %311 = tpu.matmul %274, %9, %cst_75 {dimension_numbers = #tpu.dot_dimension_numbers<[1], [0], [0], [1], [0, 0, 1, 1], [], []>} : vector<8x32xf32>, vector<32x96xf32>, vector<8x96xf32> -> vector<8x96xf32>
    %312 = vector.extract_strided_slice %310 {offsets = [0, 0], sizes = [8, 32], strides = [1, 1]} : vector<8x96xf32> to vector<8x32xf32>
    %313 = vector.extract_strided_slice %311 {offsets = [0, 0], sizes = [8, 32], strides = [1, 1]} : vector<8x96xf32> to vector<8x32xf32>
    %314 = arith.addf %312, %313 : vector<8x32xf32>
    %315 = arith.negf %314 : vector<8x32xf32>
    %316 = math.exp %315 : vector<8x32xf32>
    %cst_76 = arith.constant 1.000000e+00 : f32
    %317 = vector.broadcast %cst_76 : f32 to vector<8x32xf32>
    %318 = arith.addf %317, %316 : vector<8x32xf32>
    %319 = arith.divf %317, %318 : vector<8x32xf32>
    %320 = vector.extract_strided_slice %310 {offsets = [0, 32], sizes = [8, 32], strides = [1, 1]} : vector<8x96xf32> to vector<8x32xf32>
    %321 = vector.extract_strided_slice %311 {offsets = [0, 32], sizes = [8, 32], strides = [1, 1]} : vector<8x96xf32> to vector<8x32xf32>
    %322 = arith.addf %320, %321 : vector<8x32xf32>
    %323 = arith.negf %322 : vector<8x32xf32>
    %324 = math.exp %323 : vector<8x32xf32>
    %cst_77 = arith.constant 1.000000e+00 : f32
    %325 = vector.broadcast %cst_77 : f32 to vector<8x32xf32>
    %326 = arith.addf %325, %324 : vector<8x32xf32>
    %327 = arith.divf %325, %326 : vector<8x32xf32>
    %328 = vector.extract_strided_slice %310 {offsets = [0, 64], sizes = [8, 32], strides = [1, 1]} : vector<8x96xf32> to vector<8x32xf32>
    %329 = vector.extract_strided_slice %311 {offsets = [0, 64], sizes = [8, 32], strides = [1, 1]} : vector<8x96xf32> to vector<8x32xf32>
    %330 = arith.addf %329, %15 : vector<8x32xf32>
    %331 = arith.mulf %319, %330 : vector<8x32xf32>
    %332 = arith.addf %328, %331 : vector<8x32xf32>
    %333 = math.tanh %332 : vector<8x32xf32>
    %cst_78 = arith.constant 1.000000e+00 : f32
    %334 = vector.broadcast %cst_78 : f32 to vector<8x32xf32>
    %335 = arith.subf %334, %327 : vector<8x32xf32>
    %336 = arith.mulf %335, %333 : vector<8x32xf32>
    %337 = arith.mulf %327, %274 : vector<8x32xf32>
    %338 = arith.addf %336, %337 : vector<8x32xf32>
    %339 = arith.index_cast %278 : i32 to index
    %c0_79 = arith.constant 0 : index
    %340 = vector.load %arg15[%339, %c0_79] : memref<64x32xf32, #tpu.memory_space<vmem>>, vector<8x32xf32>
    tpu.vector_store %arg15[%339, %c0_79], %338 {strides = array<i32>} : memref<64x32xf32, #tpu.memory_space<vmem>>, vector<8x32xf32>,
    %c5_i32 = arith.constant 5 : i32
    %c8_i32_80 = arith.constant 8 : i32
    %341 = arith.muli %c5_i32, %c8_i32_80 : i32
    %342 = tpu.assume_multiple %341, 8 : i32
    %343 = arith.index_cast %342 : i32 to index
    %c0_81 = arith.constant 0 : index
    %344 = vector.load %arg14[%343, %c0_81] : memref<64x96xf32, #tpu.memory_space<vmem>>, vector<8x96xf32>
    %cst_82 = arith.constant dense<0.000000e+00> : vector<8x96xf32>
    %345 = tpu.matmul %308, %7, %cst_82 {dimension_numbers = #tpu.dot_dimension_numbers<[1], [0], [0], [1], [0, 0, 1, 1], [], []>} : vector<8x32xf32>, vector<32x96xf32>, vector<8x96xf32> -> vector<8x96xf32>
    %346 = vector.extract_strided_slice %344 {offsets = [0, 0], sizes = [8, 32], strides = [1, 1]} : vector<8x96xf32> to vector<8x32xf32>
    %347 = vector.extract_strided_slice %345 {offsets = [0, 0], sizes = [8, 32], strides = [1, 1]} : vector<8x96xf32> to vector<8x32xf32>
    %348 = arith.addf %346, %347 : vector<8x32xf32>
    %349 = arith.negf %348 : vector<8x32xf32>
    %350 = math.exp %349 : vector<8x32xf32>
    %cst_83 = arith.constant 1.000000e+00 : f32
    %351 = vector.broadcast %cst_83 : f32 to vector<8x32xf32>
    %352 = arith.addf %351, %350 : vector<8x32xf32>
    %353 = arith.divf %351, %352 : vector<8x32xf32>
    %354 = vector.extract_strided_slice %344 {offsets = [0, 32], sizes = [8, 32], strides = [1, 1]} : vector<8x96xf32> to vector<8x32xf32>
    %355 = vector.extract_strided_slice %345 {offsets = [0, 32], sizes = [8, 32], strides = [1, 1]} : vector<8x96xf32> to vector<8x32xf32>
    %356 = arith.addf %354, %355 : vector<8x32xf32>
    %357 = arith.negf %356 : vector<8x32xf32>
    %358 = math.exp %357 : vector<8x32xf32>
    %cst_84 = arith.constant 1.000000e+00 : f32
    %359 = vector.broadcast %cst_84 : f32 to vector<8x32xf32>
    %360 = arith.addf %359, %358 : vector<8x32xf32>
    %361 = arith.divf %359, %360 : vector<8x32xf32>
    %362 = vector.extract_strided_slice %344 {offsets = [0, 64], sizes = [8, 32], strides = [1, 1]} : vector<8x96xf32> to vector<8x32xf32>
    %363 = vector.extract_strided_slice %345 {offsets = [0, 64], sizes = [8, 32], strides = [1, 1]} : vector<8x96xf32> to vector<8x32xf32>
    %364 = arith.addf %363, %12 : vector<8x32xf32>
    %365 = arith.mulf %353, %364 : vector<8x32xf32>
    %366 = arith.addf %362, %365 : vector<8x32xf32>
    %367 = math.tanh %366 : vector<8x32xf32>
    %cst_85 = arith.constant 1.000000e+00 : f32
    %368 = vector.broadcast %cst_85 : f32 to vector<8x32xf32>
    %369 = arith.subf %368, %361 : vector<8x32xf32>
    %370 = arith.mulf %369, %367 : vector<8x32xf32>
    %371 = arith.mulf %361, %308 : vector<8x32xf32>
    %372 = arith.addf %370, %371 : vector<8x32xf32>
    %cst_86 = arith.constant dense<0.000000e+00> : vector<8x96xf32>
    %373 = tpu.matmul %372, %8, %cst_86 {dimension_numbers = #tpu.dot_dimension_numbers<[1], [0], [0], [1], [0, 0, 1, 1], [], []>} : vector<8x32xf32>, vector<32x96xf32>, vector<8x96xf32> -> vector<8x96xf32>
    %374 = arith.addf %373, %18 : vector<8x96xf32>
    %cst_87 = arith.constant dense<0.000000e+00> : vector<8x96xf32>
    %375 = tpu.matmul %338, %9, %cst_87 {dimension_numbers = #tpu.dot_dimension_numbers<[1], [0], [0], [1], [0, 0, 1, 1], [], []>} : vector<8x32xf32>, vector<32x96xf32>, vector<8x96xf32> -> vector<8x96xf32>
    %376 = vector.extract_strided_slice %374 {offsets = [0, 0], sizes = [8, 32], strides = [1, 1]} : vector<8x96xf32> to vector<8x32xf32>
    %377 = vector.extract_strided_slice %375 {offsets = [0, 0], sizes = [8, 32], strides = [1, 1]} : vector<8x96xf32> to vector<8x32xf32>
    %378 = arith.addf %376, %377 : vector<8x32xf32>
    %379 = arith.negf %378 : vector<8x32xf32>
    %380 = math.exp %379 : vector<8x32xf32>
    %cst_88 = arith.constant 1.000000e+00 : f32
    %381 = vector.broadcast %cst_88 : f32 to vector<8x32xf32>
    %382 = arith.addf %381, %380 : vector<8x32xf32>
    %383 = arith.divf %381, %382 : vector<8x32xf32>
    %384 = vector.extract_strided_slice %374 {offsets = [0, 32], sizes = [8, 32], strides = [1, 1]} : vector<8x96xf32> to vector<8x32xf32>
    %385 = vector.extract_strided_slice %375 {offsets = [0, 32], sizes = [8, 32], strides = [1, 1]} : vector<8x96xf32> to vector<8x32xf32>
    %386 = arith.addf %384, %385 : vector<8x32xf32>
    %387 = arith.negf %386 : vector<8x32xf32>
    %388 = math.exp %387 : vector<8x32xf32>
    %cst_89 = arith.constant 1.000000e+00 : f32
    %389 = vector.broadcast %cst_89 : f32 to vector<8x32xf32>
    %390 = arith.addf %389, %388 : vector<8x32xf32>
    %391 = arith.divf %389, %390 : vector<8x32xf32>
    %392 = vector.extract_strided_slice %374 {offsets = [0, 64], sizes = [8, 32], strides = [1, 1]} : vector<8x96xf32> to vector<8x32xf32>
    %393 = vector.extract_strided_slice %375 {offsets = [0, 64], sizes = [8, 32], strides = [1, 1]} : vector<8x96xf32> to vector<8x32xf32>
    %394 = arith.addf %393, %15 : vector<8x32xf32>
    %395 = arith.mulf %383, %394 : vector<8x32xf32>
    %396 = arith.addf %392, %395 : vector<8x32xf32>
    %397 = math.tanh %396 : vector<8x32xf32>
    %cst_90 = arith.constant 1.000000e+00 : f32
    %398 = vector.broadcast %cst_90 : f32 to vector<8x32xf32>
    %399 = arith.subf %398, %391 : vector<8x32xf32>
    %400 = arith.mulf %399, %397 : vector<8x32xf32>
    %401 = arith.mulf %391, %338 : vector<8x32xf32>
    %402 = arith.addf %400, %401 : vector<8x32xf32>
    %403 = arith.index_cast %342 : i32 to index
    %c0_91 = arith.constant 0 : index
    %404 = vector.load %arg15[%403, %c0_91] : memref<64x32xf32, #tpu.memory_space<vmem>>, vector<8x32xf32>
    tpu.vector_store %arg15[%403, %c0_91], %402 {strides = array<i32>} : memref<64x32xf32, #tpu.memory_space<vmem>>, vector<8x32xf32>,
    %c6_i32 = arith.constant 6 : i32
    %c8_i32_92 = arith.constant 8 : i32
    %405 = arith.muli %c6_i32, %c8_i32_92 : i32
    %406 = tpu.assume_multiple %405, 8 : i32
    %407 = arith.index_cast %406 : i32 to index
    %c0_93 = arith.constant 0 : index
    %408 = vector.load %arg14[%407, %c0_93] : memref<64x96xf32, #tpu.memory_space<vmem>>, vector<8x96xf32>
    %cst_94 = arith.constant dense<0.000000e+00> : vector<8x96xf32>
    %409 = tpu.matmul %372, %7, %cst_94 {dimension_numbers = #tpu.dot_dimension_numbers<[1], [0], [0], [1], [0, 0, 1, 1], [], []>} : vector<8x32xf32>, vector<32x96xf32>, vector<8x96xf32> -> vector<8x96xf32>
    %410 = vector.extract_strided_slice %408 {offsets = [0, 0], sizes = [8, 32], strides = [1, 1]} : vector<8x96xf32> to vector<8x32xf32>
    %411 = vector.extract_strided_slice %409 {offsets = [0, 0], sizes = [8, 32], strides = [1, 1]} : vector<8x96xf32> to vector<8x32xf32>
    %412 = arith.addf %410, %411 : vector<8x32xf32>
    %413 = arith.negf %412 : vector<8x32xf32>
    %414 = math.exp %413 : vector<8x32xf32>
    %cst_95 = arith.constant 1.000000e+00 : f32
    %415 = vector.broadcast %cst_95 : f32 to vector<8x32xf32>
    %416 = arith.addf %415, %414 : vector<8x32xf32>
    %417 = arith.divf %415, %416 : vector<8x32xf32>
    %418 = vector.extract_strided_slice %408 {offsets = [0, 32], sizes = [8, 32], strides = [1, 1]} : vector<8x96xf32> to vector<8x32xf32>
    %419 = vector.extract_strided_slice %409 {offsets = [0, 32], sizes = [8, 32], strides = [1, 1]} : vector<8x96xf32> to vector<8x32xf32>
    %420 = arith.addf %418, %419 : vector<8x32xf32>
    %421 = arith.negf %420 : vector<8x32xf32>
    %422 = math.exp %421 : vector<8x32xf32>
    %cst_96 = arith.constant 1.000000e+00 : f32
    %423 = vector.broadcast %cst_96 : f32 to vector<8x32xf32>
    %424 = arith.addf %423, %422 : vector<8x32xf32>
    %425 = arith.divf %423, %424 : vector<8x32xf32>
    %426 = vector.extract_strided_slice %408 {offsets = [0, 64], sizes = [8, 32], strides = [1, 1]} : vector<8x96xf32> to vector<8x32xf32>
    %427 = vector.extract_strided_slice %409 {offsets = [0, 64], sizes = [8, 32], strides = [1, 1]} : vector<8x96xf32> to vector<8x32xf32>
    %428 = arith.addf %427, %12 : vector<8x32xf32>
    %429 = arith.mulf %417, %428 : vector<8x32xf32>
    %430 = arith.addf %426, %429 : vector<8x32xf32>
    %431 = math.tanh %430 : vector<8x32xf32>
    %cst_97 = arith.constant 1.000000e+00 : f32
    %432 = vector.broadcast %cst_97 : f32 to vector<8x32xf32>
    %433 = arith.subf %432, %425 : vector<8x32xf32>
    %434 = arith.mulf %433, %431 : vector<8x32xf32>
    %435 = arith.mulf %425, %372 : vector<8x32xf32>
    %436 = arith.addf %434, %435 : vector<8x32xf32>
    %cst_98 = arith.constant dense<0.000000e+00> : vector<8x96xf32>
    %437 = tpu.matmul %436, %8, %cst_98 {dimension_numbers = #tpu.dot_dimension_numbers<[1], [0], [0], [1], [0, 0, 1, 1], [], []>} : vector<8x32xf32>, vector<32x96xf32>, vector<8x96xf32> -> vector<8x96xf32>
    %438 = arith.addf %437, %18 : vector<8x96xf32>
    %cst_99 = arith.constant dense<0.000000e+00> : vector<8x96xf32>
    %439 = tpu.matmul %402, %9, %cst_99 {dimension_numbers = #tpu.dot_dimension_numbers<[1], [0], [0], [1], [0, 0, 1, 1], [], []>} : vector<8x32xf32>, vector<32x96xf32>, vector<8x96xf32> -> vector<8x96xf32>
    %440 = vector.extract_strided_slice %438 {offsets = [0, 0], sizes = [8, 32], strides = [1, 1]} : vector<8x96xf32> to vector<8x32xf32>
    %441 = vector.extract_strided_slice %439 {offsets = [0, 0], sizes = [8, 32], strides = [1, 1]} : vector<8x96xf32> to vector<8x32xf32>
    %442 = arith.addf %440, %441 : vector<8x32xf32>
    %443 = arith.negf %442 : vector<8x32xf32>
    %444 = math.exp %443 : vector<8x32xf32>
    %cst_100 = arith.constant 1.000000e+00 : f32
    %445 = vector.broadcast %cst_100 : f32 to vector<8x32xf32>
    %446 = arith.addf %445, %444 : vector<8x32xf32>
    %447 = arith.divf %445, %446 : vector<8x32xf32>
    %448 = vector.extract_strided_slice %438 {offsets = [0, 32], sizes = [8, 32], strides = [1, 1]} : vector<8x96xf32> to vector<8x32xf32>
    %449 = vector.extract_strided_slice %439 {offsets = [0, 32], sizes = [8, 32], strides = [1, 1]} : vector<8x96xf32> to vector<8x32xf32>
    %450 = arith.addf %448, %449 : vector<8x32xf32>
    %451 = arith.negf %450 : vector<8x32xf32>
    %452 = math.exp %451 : vector<8x32xf32>
    %cst_101 = arith.constant 1.000000e+00 : f32
    %453 = vector.broadcast %cst_101 : f32 to vector<8x32xf32>
    %454 = arith.addf %453, %452 : vector<8x32xf32>
    %455 = arith.divf %453, %454 : vector<8x32xf32>
    %456 = vector.extract_strided_slice %438 {offsets = [0, 64], sizes = [8, 32], strides = [1, 1]} : vector<8x96xf32> to vector<8x32xf32>
    %457 = vector.extract_strided_slice %439 {offsets = [0, 64], sizes = [8, 32], strides = [1, 1]} : vector<8x96xf32> to vector<8x32xf32>
    %458 = arith.addf %457, %15 : vector<8x32xf32>
    %459 = arith.mulf %447, %458 : vector<8x32xf32>
    %460 = arith.addf %456, %459 : vector<8x32xf32>
    %461 = math.tanh %460 : vector<8x32xf32>
    %cst_102 = arith.constant 1.000000e+00 : f32
    %462 = vector.broadcast %cst_102 : f32 to vector<8x32xf32>
    %463 = arith.subf %462, %455 : vector<8x32xf32>
    %464 = arith.mulf %463, %461 : vector<8x32xf32>
    %465 = arith.mulf %455, %402 : vector<8x32xf32>
    %466 = arith.addf %464, %465 : vector<8x32xf32>
    %467 = arith.index_cast %406 : i32 to index
    %c0_103 = arith.constant 0 : index
    %468 = vector.load %arg15[%467, %c0_103] : memref<64x32xf32, #tpu.memory_space<vmem>>, vector<8x32xf32>
    tpu.vector_store %arg15[%467, %c0_103], %466 {strides = array<i32>} : memref<64x32xf32, #tpu.memory_space<vmem>>, vector<8x32xf32>,
    %c7_i32 = arith.constant 7 : i32
    %c8_i32_104 = arith.constant 8 : i32
    %469 = arith.muli %c7_i32, %c8_i32_104 : i32
    %470 = tpu.assume_multiple %469, 8 : i32
    %471 = arith.index_cast %470 : i32 to index
    %c0_105 = arith.constant 0 : index
    %472 = vector.load %arg14[%471, %c0_105] : memref<64x96xf32, #tpu.memory_space<vmem>>, vector<8x96xf32>
    %cst_106 = arith.constant dense<0.000000e+00> : vector<8x96xf32>
    %473 = tpu.matmul %436, %7, %cst_106 {dimension_numbers = #tpu.dot_dimension_numbers<[1], [0], [0], [1], [0, 0, 1, 1], [], []>} : vector<8x32xf32>, vector<32x96xf32>, vector<8x96xf32> -> vector<8x96xf32>
    %474 = vector.extract_strided_slice %472 {offsets = [0, 0], sizes = [8, 32], strides = [1, 1]} : vector<8x96xf32> to vector<8x32xf32>
    %475 = vector.extract_strided_slice %473 {offsets = [0, 0], sizes = [8, 32], strides = [1, 1]} : vector<8x96xf32> to vector<8x32xf32>
    %476 = arith.addf %474, %475 : vector<8x32xf32>
    %477 = arith.negf %476 : vector<8x32xf32>
    %478 = math.exp %477 : vector<8x32xf32>
    %cst_107 = arith.constant 1.000000e+00 : f32
    %479 = vector.broadcast %cst_107 : f32 to vector<8x32xf32>
    %480 = arith.addf %479, %478 : vector<8x32xf32>
    %481 = arith.divf %479, %480 : vector<8x32xf32>
    %482 = vector.extract_strided_slice %472 {offsets = [0, 32], sizes = [8, 32], strides = [1, 1]} : vector<8x96xf32> to vector<8x32xf32>
    %483 = vector.extract_strided_slice %473 {offsets = [0, 32], sizes = [8, 32], strides = [1, 1]} : vector<8x96xf32> to vector<8x32xf32>
    %484 = arith.addf %482, %483 : vector<8x32xf32>
    %485 = arith.negf %484 : vector<8x32xf32>
    %486 = math.exp %485 : vector<8x32xf32>
    %cst_108 = arith.constant 1.000000e+00 : f32
    %487 = vector.broadcast %cst_108 : f32 to vector<8x32xf32>
    %488 = arith.addf %487, %486 : vector<8x32xf32>
    %489 = arith.divf %487, %488 : vector<8x32xf32>
    %490 = vector.extract_strided_slice %472 {offsets = [0, 64], sizes = [8, 32], strides = [1, 1]} : vector<8x96xf32> to vector<8x32xf32>
    %491 = vector.extract_strided_slice %473 {offsets = [0, 64], sizes = [8, 32], strides = [1, 1]} : vector<8x96xf32> to vector<8x32xf32>
    %492 = arith.addf %491, %12 : vector<8x32xf32>
    %493 = arith.mulf %481, %492 : vector<8x32xf32>
    %494 = arith.addf %490, %493 : vector<8x32xf32>
    %495 = math.tanh %494 : vector<8x32xf32>
    %cst_109 = arith.constant 1.000000e+00 : f32
    %496 = vector.broadcast %cst_109 : f32 to vector<8x32xf32>
    %497 = arith.subf %496, %489 : vector<8x32xf32>
    %498 = arith.mulf %497, %495 : vector<8x32xf32>
    %499 = arith.mulf %489, %436 : vector<8x32xf32>
    %500 = arith.addf %498, %499 : vector<8x32xf32>
    %cst_110 = arith.constant dense<0.000000e+00> : vector<8x96xf32>
    %501 = tpu.matmul %500, %8, %cst_110 {dimension_numbers = #tpu.dot_dimension_numbers<[1], [0], [0], [1], [0, 0, 1, 1], [], []>} : vector<8x32xf32>, vector<32x96xf32>, vector<8x96xf32> -> vector<8x96xf32>
    %502 = arith.addf %501, %18 : vector<8x96xf32>
    %cst_111 = arith.constant dense<0.000000e+00> : vector<8x96xf32>
    %503 = tpu.matmul %466, %9, %cst_111 {dimension_numbers = #tpu.dot_dimension_numbers<[1], [0], [0], [1], [0, 0, 1, 1], [], []>} : vector<8x32xf32>, vector<32x96xf32>, vector<8x96xf32> -> vector<8x96xf32>
    %504 = vector.extract_strided_slice %502 {offsets = [0, 0], sizes = [8, 32], strides = [1, 1]} : vector<8x96xf32> to vector<8x32xf32>
    %505 = vector.extract_strided_slice %503 {offsets = [0, 0], sizes = [8, 32], strides = [1, 1]} : vector<8x96xf32> to vector<8x32xf32>
    %506 = arith.addf %504, %505 : vector<8x32xf32>
    %507 = arith.negf %506 : vector<8x32xf32>
    %508 = math.exp %507 : vector<8x32xf32>
    %cst_112 = arith.constant 1.000000e+00 : f32
    %509 = vector.broadcast %cst_112 : f32 to vector<8x32xf32>
    %510 = arith.addf %509, %508 : vector<8x32xf32>
    %511 = arith.divf %509, %510 : vector<8x32xf32>
    %512 = vector.extract_strided_slice %502 {offsets = [0, 32], sizes = [8, 32], strides = [1, 1]} : vector<8x96xf32> to vector<8x32xf32>
    %513 = vector.extract_strided_slice %503 {offsets = [0, 32], sizes = [8, 32], strides = [1, 1]} : vector<8x96xf32> to vector<8x32xf32>
    %514 = arith.addf %512, %513 : vector<8x32xf32>
    %515 = arith.negf %514 : vector<8x32xf32>
    %516 = math.exp %515 : vector<8x32xf32>
    %cst_113 = arith.constant 1.000000e+00 : f32
    %517 = vector.broadcast %cst_113 : f32 to vector<8x32xf32>
    %518 = arith.addf %517, %516 : vector<8x32xf32>
    %519 = arith.divf %517, %518 : vector<8x32xf32>
    %520 = vector.extract_strided_slice %502 {offsets = [0, 64], sizes = [8, 32], strides = [1, 1]} : vector<8x96xf32> to vector<8x32xf32>
    %521 = vector.extract_strided_slice %503 {offsets = [0, 64], sizes = [8, 32], strides = [1, 1]} : vector<8x96xf32> to vector<8x32xf32>
    %522 = arith.addf %521, %15 : vector<8x32xf32>
    %523 = arith.mulf %511, %522 : vector<8x32xf32>
    %524 = arith.addf %520, %523 : vector<8x32xf32>
    %525 = math.tanh %524 : vector<8x32xf32>
    %cst_114 = arith.constant 1.000000e+00 : f32
    %526 = vector.broadcast %cst_114 : f32 to vector<8x32xf32>
    %527 = arith.subf %526, %519 : vector<8x32xf32>
    %528 = arith.mulf %527, %525 : vector<8x32xf32>
    %529 = arith.mulf %519, %466 : vector<8x32xf32>
    %530 = arith.addf %528, %529 : vector<8x32xf32>
    %531 = arith.index_cast %470 : i32 to index
    %c0_115 = arith.constant 0 : index
    %532 = vector.load %arg15[%531, %c0_115] : memref<64x32xf32, #tpu.memory_space<vmem>>, vector<8x32xf32>
    tpu.vector_store %arg15[%531, %c0_115], %530 {strides = array<i32>} : memref<64x32xf32, #tpu.memory_space<vmem>>, vector<8x32xf32>,
    %c8_i32_116 = arith.constant 8 : i32
    %c0_117 = arith.constant 0 : index
    %c0_118 = arith.constant 0 : index
    %533 = vector.load %arg15[%c0_117, %c0_118] : memref<64x32xf32, #tpu.memory_space<vmem>>, vector<64x32xf32>
    %c0_119 = arith.constant 0 : index
    %c0_120 = arith.constant 0 : index
    %534 = vector.load %arg9[%c0_119, %c0_120] : memref<32x64xf32, #tpu.memory_space<vmem>>, vector<32x64xf32>
    %cst_121 = arith.constant dense<0.000000e+00> : vector<64x64xf32>
    %535 = tpu.matmul %533, %534, %cst_121 {dimension_numbers = #tpu.dot_dimension_numbers<[1], [0], [0], [1], [0, 0, 1, 1], [], []>} : vector<64x32xf32>, vector<32x64xf32>, vector<64x64xf32> -> vector<64x64xf32>
    %c0_122 = arith.constant 0 : index
    %c0_123 = arith.constant 0 : index
    %536 = vector.load %arg10[%c0_122, %c0_123] : memref<1x64xf32, #tpu.memory_space<vmem>>, vector<1x64xf32>
    %537 = vector.broadcast %536 : vector<1x64xf32> to vector<64x64xf32>
    %538 = arith.addf %535, %537 : vector<64x64xf32>
    %cst_124 = arith.constant 0.000000e+00 : f32
    %539 = vector.broadcast %cst_124 : f32 to vector<64x64xf32>
    %540 = arith.maximumf %538, %539 : vector<64x64xf32>
    %c0_125 = arith.constant 0 : index
    %c0_126 = arith.constant 0 : index
    %541 = vector.load %arg11[%c0_125, %c0_126] : memref<64x128xf32, #tpu.memory_space<vmem>>, vector<64x128xf32>
    %cst_127 = arith.constant dense<0.000000e+00> : vector<64x128xf32>
    %542 = tpu.matmul %540, %541, %cst_127 {dimension_numbers = #tpu.dot_dimension_numbers<[1], [0], [0], [1], [0, 0, 1, 1], [], []>} : vector<64x64xf32>, vector<64x128xf32>, vector<64x128xf32> -> vector<64x128xf32>
    %c0_128 = arith.constant 0 : index
    %c0_129 = arith.constant 0 : index
    %543 = vector.load %arg12[%c0_128, %c0_129] : memref<1x128xf32, #tpu.memory_space<vmem>>, vector<1x128xf32>
    %544 = vector.broadcast %543 : vector<1x128xf32> to vector<64x128xf32>
    %545 = arith.addf %542, %544 : vector<64x128xf32>
    %546 = tpu.iota {dimensions = array<i32: 1>} : vector<64x128xi32>
    %c13_i32 = arith.constant 13 : i32
    %547 = vector.broadcast %c13_i32 : i32 to vector<64x128xi32>
    %548 = arith.cmpi slt, %546, %547 : vector<64x128xi32>
    %549 = math.tanh %545 : vector<64x128xf32>
    %550 = arith.select %548, %545, %549 : vector<64x128xi1>, vector<64x128xf32>
    %c0_130 = arith.constant 0 : index
    %c0_131 = arith.constant 0 : index
    %551 = vector.load %arg13[%c0_130, %c0_131] : memref<64x128xf32, #tpu.memory_space<vmem>>, vector<64x128xf32>
    tpu.vector_store %arg13[%c0_130, %c0_131], %550 {strides = array<i32>} : memref<64x128xf32, #tpu.memory_space<vmem>>, vector<64x128xf32>,
    return
  }
}

</mosaic_0001>

<bundles_post_ra>
// kernel: seld_decoder_forward.1
= control target key start
LH: loop header
LB: loop body
LE: loop exit
PB: predicated region body
PF: predicated region fallthrough
CT: control target
= control target key end

     0   :  { %vm61_vm0 = vcmask 130048   ;;  %v3645_v3 = vmov 0.0|0.0   ;;  %vm3646_vm1 = vmmov 0   ;;  %v3647_v4 = vmov 0.0   ;;  %s3648_s27 = smov 64   ;;  %s4256_s1 = inlined_call_operand.vmem [shape: f32[16,96], index: 1, kind: input, shape index: {}]   ;;  %s4257_s0 = inlined_call_operand.vmem [shape: f32[64,16], index: 0, kind: input, shape index: {}]   ;;  %s4258_s3 = inlined_call_operand.vmem [shape: f32[32,96], index: 3, kind: input, shape index: {}]   ;;  %s4259_s4 = inlined_call_operand.vmem [shape: f32[1,32], index: 4, kind: input, shape index: {}]   ;;  %s4260_s2 = inlined_call_operand.vmem [shape: f32[1,96], index: 2, kind: input, shape index: {}]   ;;  %s4261_s7 = inlined_call_operand.vmem [shape: f32[32,96], index: 7, kind: input, shape index: {}]   ;;  %s4262_s5 = inlined_call_operand.vmem [shape: f32[32,96], index: 5, kind: input, shape index: {}]   ;;  %s4263_s8 = inlined_call_operand.vmem [shape: f32[1,32], index: 8, kind: input, shape index: {}]   ;;  %s4264_s6 = inlined_call_operand.vmem [shape: f32[1,96], index: 6, kind: input, shape index: {}]   ;;  %s4265_s9 = inlined_call_operand.vmem [shape: f32[32,64], index: 9, kind: input, shape index: {}]   ;;  %s4266_s11 = inlined_call_operand.vmem [shape: f32[64,128], index: 11, kind: input, shape index: {}]   ;;  %s4267_s10 = inlined_call_operand.vmem [shape: f32[1,64], index: 10, kind: input, shape index: {}]   ;;  %s4268_s12 = inlined_call_operand.vmem [shape: f32[1,128], index: 12, kind: input, shape index: {}]   ;;  %s4269_s13 = inlined_call_operand.vmem [shape: f32[64,128], index: 13, kind: output, shape index: {}]  }
   0x1   :  { %v52_v0 = vld [vmem:[%s4256_s1] sm:$0xff]  ;;  %v53_v1 = vld [vmem:[%s4256_s1 + $0x8] sm:$0xff]  ;;  %3365 = vmatprep.subr.bf16.mxu1 %v3645_v3  ;;  %3062 = vmatprep.mubr.msk.f32.mxu1 %vm3646_vm1, %v3647_v4  ;;  %v46_v11 = vld [vmem:[%s4257_s0 + $0x10] sm:$0xff]  ;;  %vm191_vm2 = vcmask 785408   ;;  %vm232_vm3 = vcmask 261120   ;;  %vm2640_vm4 = vcmask 523264  }
   0x2   :  { %v44_v2 = vld [vmem:[%s4257_s0] sm:$0xff]  ;;  %v3355_v5 = vpack.c.bf16 %v53_v1, %v52_v0  ;;  %v201_v7 = vld [vmem:[%s4258_s3 + $0x8] sm:$0xff]  ;;  %v202_v12 = vld [vmem:[%s4258_s3 + $0x10] sm:$0xff] }
   0x3   :  { %3031 = vmatprep.mubr.msk.f32.mxu0 %vm61_vm0, %v44_v2  ;;  %v200_v6 = vld [vmem:[%s4258_s3] sm:$0xff]  ;;  %v45_v8 = vld [vmem:[%s4257_s0 + $0x8] sm:$0xff]  ;;  %v203_v13 = vld [vmem:[%s4258_s3 + $0x18] sm:$0xff] }
   0x4   :  { %3356 = vmatprep.subr.bf16.mxu0 %v3355_v5  ;;  %v3742_v9 = vpack.c.bf16 %v201_v7, %v200_v6  ;;  %v2810_v10 = vld [vmem:[%s4259_s4] ss:$0 sm:$0xff]  ;;  %v47_v14 = vld [vmem:[%s4257_s0 + $0x18] sm:$0xff]  ;;  %v3764_v15 = vpack.c.bf16 %v203_v13, %v202_v12  ;;  %v49_v17 = vld [vmem:[%s4257_s0 + $0x28] sm:$0xff] }
   0x5   :  { %3358 = vmatpush3.bf16.msra.mxu0 %v3355_v5  ;;  %313 = vrot.lane.b32.xlu0 %v2810_v10, %s3648_s27  ;;  %v48_v16 = vld [vmem:[%s4257_s0 + $0x20] sm:$0xff]  ;;  %v50_v18 = vld [vmem:[%s4257_s0 + $0x30] sm:$0xff]  ;;  %v51_v19 = vld [vmem:[%s4257_s0 + $0x38] sm:$0xff] }
   0x6   :  { %3359 = vmatprep.subr.bf16.mxu0 %v3645_v3  ;;  %v2801_v20 = vld [vmem:[%s4260_s2] ss:$0 sm:$0xff]  ;;  %v209_v52 = vld [vmem:[%s4261_s7 + $0x8] sm:$0xff]  ;;  %v210_v53 = vld [vmem:[%s4261_s7 + $0x10] sm:$0xff] }
   0x7   :  { %v208_v51 = vld [vmem:[%s4261_s7] sm:$0xff]  ;;  %v211_v55 = vld [vmem:[%s4261_s7 + $0x18] sm:$0xff]  ;;  %v205_v57 = vld [vmem:[%s4262_s5 + $0x8] sm:$0xff]  ;;  %s3649_s7 = smov 96  }
   0x8   :  { %3032 = vmatmul.mubr.msk.f32.vlgmr.msra.gmra.mrb[0].mxu0 %vm61_vm0, %v45_v8  ;;  %v3816_v54 = vpack.c.bf16 %v209_v52, %v208_v51  ;;  %v204_v56 = vld [vmem:[%s4262_s5] sm:$0xff]  ;;  %v206_v59 = vld [vmem:[%s4262_s5 + $0x10] sm:$0xff]  ;;  %v207_v60 = vld [vmem:[%s4262_s5 + $0x18] sm:$0xff]  ;;  %v3836_v61 = vpack.c.bf16 %v211_v55, %v210_v53 }
   0x9   :  { %3361 = vmatpush3.bf16.msra.mxu0 %v3742_v9  ;;  %3034 = vmatprep.mubr.msk.f32.mxu0 %vm61_vm0, %v46_v11  ;;  %v3827_v58 = vpack.c.bf16 %v205_v57, %v204_v56  ;;  %v3840_v62 = vpack.c.bf16 %v207_v60, %v206_v59  ;;  %v2811_v6 = vld [vmem:[%s4263_s8] ss:$0 sm:$0xff] }
   0xa   :  { %3362 = vmatprep.subr.bf16.mxu0 %v3645_v3 }
   0xb   :  { %3367 = vmatpush3.bf16.msra.mxu1 %v3827_v58 }
   0xc   :  { %3035 = vmatmul.mubr.msk.f32.gmra.mrb[2].mxu0 %vm61_vm0, %v47_v14  ;;  %3368 = vmatprep.subr.bf16.mxu1 %v3645_v3  ;;  %v3884_v14 = vld [vmem:[%s4264_s6] ss:$0 sm:$0xff] }
   0xd   :  { %3037 = vmatprep.mubr.msk.f32.mxu0 %vm61_vm0, %v48_v16  ;;  %3364 = vmatpush3.bf16.msra.mxu0 %v3764_v15 }
   0xe   :  { %3371 = vmatprep.subr.bf16.mxu0 %v3645_v3 }
   0xf   :  { %3370 = vmatpush3.bf16.msra.mxu1 %v3840_v62 }
  0x10   :  { %3038 = vmatmul.mubr.msk.f32.gmra.mrb[4].mxu0 %vm61_vm0, %v49_v17  ;;  %3377 = vmatprep.subr.bf16.mxu1 %v3645_v3 }
  0x11   :  { %3040 = vmatprep.mubr.msk.f32.mxu0 %vm61_vm0, %v50_v18 }
  0x14   :  { %3041 = vmatmul.mubr.msk.f32.gmra.mrb[6].mxu0 %vm61_vm0, %v51_v19 }
  0x15   :  { %3051 = vmatprep.mubr.msk.f32.mxu0 %vm3646_vm1, %v3647_v4 }
  0x18   :  { %3052 = vmatmul.mubr.f32.vlgmr.msra.gmra.mrb[8].mxu0 %v3647_v4 }
  0x19   :  { %3073 = vmatprep.mubr.msk.f32.mxu0 %vm3646_vm1, %v3647_v4  ;;  %3373 = vmatpush3.bf16.msra.mxu0 %v3816_v54 }
  0x1a   :  { %3374 = vmatprep.subr.bf16.mxu0 %v3645_v3 }
  0x1d   :  { %3376 = vmatpush3.bf16.msra.mxu0 %v3836_v61 }
  0x1e   :  { %3383 = vmatprep.subr.bf16.mxu0 %v3645_v3 }
  0x20   :  { %3074 = vmatmul.mubr.f32.vlgmr.msra.gmra.mrb[10].mxu0 %v3647_v4 }
  0x21   :  { %3385 = vmatpush3.bf16.msra.mxu0 %v3827_v58  ;;  %3095 = vmatprep.mubr.msk.f32.mxu0 %vm3646_vm1, %v3647_v4 }
  0x22   :  { %3386 = vmatprep.subr.bf16.mxu0 %v3645_v3 }
  0x25   :  { %3388 = vmatpush3.bf16.msra.mxu0 %v3840_v62 }
  0x26   :  { %3395 = vmatprep.subr.bf16.mxu0 %v3645_v3 }
  0x77   :  { %v3800_v37 = vpop.permute.xlu0 %313 }
  0xdb   :  { %v3033_v21 = vpop.f32.mrb[0].mxu0 }
  0xdc   :  { %v158_v22 = vadd.f32 %v3033_v21, %v2801_v20  ;;  %v152_v23 = vpop.f32.mrb[1].mxu0 }
  0xdd   :  { %v153_v24 = vadd.f32 %v2801_v20, %v152_v23 }
  0xde   :  { %193 = vst.msk [vmem:[#allocation2 + $0x8] sm:$0xff] %vm191_vm2, %v158_v22 }
  0xdf   :  { %192 = vst.msk [vmem:[#allocation2] sm:$0xff] %vm191_vm2, %v153_v24  ;;  %v3036_v25 = vpop.f32.mrb[2].mxu0 }
  0xe0   :  { %v168_v26 = vadd.f32 %v3036_v25, %v2801_v20  ;;  %v162_v27 = vpop.f32.mrb[3].mxu0 }
  0xe1   :  { %v163_v28 = vadd.f32 %v2801_v20, %v162_v27 }
  0xe2   :  { %195 = vst.msk [vmem:[#allocation2 + $0x18] sm:$0xff] %vm191_vm2, %v168_v26 }
  0xe3   :  { %194 = vst.msk [vmem:[#allocation2 + $0x10] sm:$0xff] %vm191_vm2, %v163_v28  ;;  %v3039_v29 = vpop.f32.mrb[4].mxu0 }
  0xe4   :  { %v178_v30 = vadd.f32 %v3039_v29, %v2801_v20  ;;  %v172_v31 = vpop.f32.mrb[5].mxu0 }
  0xe5   :  { %v173_v32 = vadd.f32 %v2801_v20, %v172_v31  ;;  %v517_v29 = vld [vmem:[#allocation2 + $0x8] sm:$0xff] }
  0xe6   :  { %197 = vst.msk [vmem:[#allocation2 + $0x28] sm:$0xff] %vm191_vm2, %v178_v30  ;;  %v231_v41 = vld [vmem:[#allocation2] sm:$0xff] }
  0xe7   :  { %196 = vst.msk [vmem:[#allocation2 + $0x20] sm:$0xff] %vm191_vm2, %v173_v32  ;;  %v3042_v33 = vpop.f32.mrb[6].mxu0 }
  0xe8   :  { %v188_v34 = vadd.f32 %v3042_v33, %v2801_v20  ;;  %v182_v35 = vpop.f32.mrb[7].mxu0 }
  0xe9   :  { %v183_v36 = vadd.f32 %v2801_v20, %v182_v35 }
  0xea   :  { %199 = vst.msk [vmem:[#allocation2 + $0x38] sm:$0xff] %vm191_vm2, %v188_v34 }
  0xeb   :  { %198 = vst.msk [vmem:[#allocation2 + $0x30] sm:$0xff] %vm191_vm2, %v183_v36  ;;  %v302_v38 = vpop.f32.mrb[8].mxu0 }
  0xec   :  { %v316_v39 = vadd.f32 %v3800_v37, %v302_v38  ;;  %v3053_v40 = vpop.f32.mrb[9].mxu0  ;;  %v306_v42 = vadd.f32 %v302_v38, %v231_v41 }
  0xee   :  { %318 = vrot.lane.b32.xlu0 %v316_v39, %s3648_s27  ;;  %v2813_v43 = vmul.f32 -1.442695, %v306_v42 }
  0xf0   :  { %3532 = vpow2.f32 %v2813_v43 }
  0xf3   :  { %v477_v8 = vpop.f32.mrb[10].mxu0 }
  0xf4   :  { %v3075_v10 = vpop.f32.mrb[11].mxu0 }
  0xfa   :  { %v3533_v44 = vpop.eup %3532 }
  0xfb   :  { %v310_v45 = vadd.f32 1.0, %v3533_v44 }
  0xfd   :  { %3534 = vrcp.f32 %v310_v45 }
 0x107   :  { %v3535_v46 = vpop.eup %3534 }
 0x108   :  { %v328_v0 = vsub.f32 1.0, %v3535_v46  ;;  %v334_v2 = vmul.f32 0.0, %v3535_v46 }
 0x160   :  { %v319_v47 = vpop.permute.xlu0 %318 }
 0x161   :  { %v321_v48 = vmul.f32 %v3535_v46, %v319_v47 }
 0x163   :  { %323 = vrot.lane.b32.xlu1 %v321_v48, %s3648_s27 }
 0x1d5   :  { %v324_v49 = vpop.permute.xlu1 %323 }
 0x1d6   :  { %v326_v50 = vadd.f32 %v324_v49, %v231_v41 }
 0x1d8   :  { %3536 = vtanh.f32 %v326_v50 }
 0x1e2   :  { %v3537_v63 = vpop.eup %3536 }
 0x1e3   :  { %330 = vrot.lane.b32.xlu1 %v3537_v63, %s3649_s7 }
 0x1e7   :  { %488 = vrot.lane.b32.xlu1 %v2811_v6, %s3648_s27 }
 0x255   :  { %v331_v1 = vpop.permute.xlu1 %330 }
 0x256   :  { %v333_v5 = vmul.f32 %v331_v1, %v328_v0 }
 0x258   :  { %v3859_v7 = vadd.f32 %v334_v2, %v333_v5 }
 0x259   :  { %v3863_v11 = vpop.permute.xlu1 %488 }
 0x25a   :  { %337 = vrot.lane.b32.xlu0 %v3859_v7, %s3649_s7  ;;  %v491_v12 = vadd.f32 %v3863_v11, %v477_v8 }
 0x25c   :  { %493 = vrot.lane.b32.xlu1 %v491_v12, %s3648_s27 }
 0x2cc   :  { %v338_v13 = vpop.permute.xlu0 %337 }
 0x2cd   :  { %3063 = vmatmul.mubr.msk.f32.vlgmr.msra.gmra.mrb[0].mxu1 %vm232_vm3, %v338_v13 }
 0x2ce   :  { %3379 = vmatpush3.bf16.msra.mxu1 %v3742_v9  ;;  %3084 = vmatprep.mubr.msk.f32.mxu1 %vm3646_vm1, %v3647_v4  ;;  %v494_v26 = vpop.permute.xlu1 %493 }
 0x2cf   :  { %3380 = vmatprep.subr.bf16.mxu1 %v3645_v3 }
 0x2d2   :  { %3382 = vmatpush3.bf16.msra.mxu1 %v3764_v15 }
 0x2d3   :  { %3389 = vmatprep.subr.bf16.mxu1 %v3645_v3 }
 0x2d5   :  { %3085 = vmatmul.mubr.msk.f32.vlgmr.msra.gmra.mrb[2].mxu1 %vm232_vm3, %v338_v13 }
 0x2d6   :  { %3391 = vmatpush3.bf16.msra.mxu1 %v3816_v54  ;;  %3106 = vmatprep.mubr.msk.f32.mxu1 %vm3646_vm1, %v3647_v4 }
 0x2d7   :  { %3392 = vmatprep.subr.bf16.mxu1 %v3645_v3 }
 0x2da   :  { %3394 = vmatpush3.bf16.msra.mxu1 %v3836_v61 }
 0x2db   :  { %3401 = vmatprep.subr.bf16.mxu1 %v3645_v3 }
 0x3a0   :  { %v407_v16 = vpop.f32.mrb[0].mxu1 }
 0x3a1   :  { %v408_v17 = vadd.f32 %v3884_v14, %v407_v16  ;;  %v3064_v18 = vpop.f32.mrb[1].mxu1 }
 0x3a2   :  { %v796_v18 = vld [vmem:[#allocation2 + $0x10] sm:$0xff] }
 0x3a3   :  { %v481_v19 = vadd.f32 %v477_v8, %v408_v17 }
 0x3a5   :  { %v2815_v20 = vmul.f32 -1.442695, %v481_v19 }
 0x3a7   :  { %3538 = vpow2.f32 %v2815_v20 }
 0x3a8   :  { %v584_v21 = vpop.f32.mrb[2].mxu1 }
 0x3a9   :  { %v595_v22 = vadd.f32 %v584_v21, %v3800_v37  ;;  %v3086_v23 = vpop.f32.mrb[3].mxu1  ;;  %v588_v30 = vadd.f32 %v584_v21, %v517_v29 }
 0x3ab   :  { %597 = vrot.lane.b32.xlu0 %v595_v22, %s3648_s27  ;;  %v2817_v31 = vmul.f32 -1.442695, %v588_v30 }
 0x3b1   :  { %v3539_v24 = vpop.eup %3538 }
 0x3b2   :  { %v485_v25 = vadd.f32 1.0, %v3539_v24 }
 0x3b4   :  { %3540 = vrcp.f32 %v485_v25 }
 0x3b5   :  { %3542 = vpow2.f32 %v2817_v31 }
 0x3be   :  { %v3541_v27 = vpop.eup %3540 }
 0x3bf   :  { %v496_v28 = vmul.f32 %v3541_v27, %v494_v26  ;;  %v3543_v32 = vpop.eup %3542  ;;  %v503_v44 = vsub.f32 1.0, %v3541_v27  ;;  %v509_v46 = vmul.f32 0.0, %v3541_v27 }
 0x3c0   :  { %v592_v33 = vadd.f32 1.0, %v3543_v32 }
 0x3c1   :  { %498 = vrot.lane.b32.xlu1 %v496_v28, %s3648_s27 }
 0x3c2   :  { %3544 = vrcp.f32 %v592_v33 }
 0x3cc   :  { %v3545_v34 = vpop.eup %3544 }
 0x3cd   :  { %v607_v49 = vsub.f32 1.0, %v3545_v34  ;;  %v613_v51 = vmul.f32 %v3545_v34, %v3859_v7 }
 0x41d   :  { %v598_v35 = vpop.permute.xlu0 %597 }
 0x41e   :  { %v600_v36 = vmul.f32 %v3545_v34, %v598_v35 }
 0x420   :  { %602 = vrot.lane.b32.xlu0 %v600_v36, %s3648_s27 }
 0x433   :  { %v499_v38 = vpop.permute.xlu1 %498 }
 0x434   :  { %v501_v39 = vadd.f32 %v499_v38, %v408_v17 }
 0x436   :  { %3546 = vtanh.f32 %v501_v39 }
 0x440   :  { %v3547_v40 = vpop.eup %3546 }
 0x441   :  { %505 = vrot.lane.b32.xlu1 %v3547_v40, %s3649_s7 }
 0x492   :  { %v603_v41 = vpop.permute.xlu0 %602 }
 0x493   :  { %v605_v42 = vadd.f32 %v603_v41, %v517_v29 }
 0x495   :  { %3548 = vtanh.f32 %v605_v42 }
 0x49f   :  { %v3549_v43 = vpop.eup %3548 }
 0x4a0   :  { %609 = vrot.lane.b32.xlu0 %v3549_v43, %s3649_s7 }
 0x4b3   :  { %v506_v45 = vpop.permute.xlu1 %505 }
 0x4b4   :  { %v508_v47 = vmul.f32 %v506_v45, %v503_v44 }
 0x4b6   :  { %v3893_v48 = vadd.f32 %v509_v46, %v508_v47 }
 0x4b8   :  { %512 = vrot.lane.b32.xlu1 %v3893_v48, %s3649_s7 }
 0x512   :  { %v610_v50 = vpop.permute.xlu0 %609 }
 0x513   :  { %v612_v52 = vmul.f32 %v610_v50, %v607_v49 }
 0x515   :  { %v3898_v53 = vadd.f32 %v613_v51, %v612_v52 }
 0x517   :  { %616 = vrot.lane.b32.xlu0 %v3898_v53, %s3649_s7 }
 0x52a   :  { %v513_v55 = vpop.permute.xlu1 %512 }
 0x52b   :  { %515 = vst.msk [vmem:[#allocation3] sm:$0xff] %vm232_vm3, %v513_v55  ;;  %3107 = vmatmul.mubr.msk.f32.vlgmr.msra.gmra.mrb[4].mxu1 %vm232_vm3, %v513_v55 }
 0x52c   :  { %3403 = vmatpush3.bf16.msra.mxu1 %v3827_v58  ;;  %3128 = vmatprep.mubr.msk.f32.mxu1 %vm3646_vm1, %v3647_v4 }
 0x52d   :  { %3404 = vmatprep.subr.bf16.mxu1 %v3645_v3 }
 0x530   :  { %3406 = vmatpush3.bf16.msra.mxu1 %v3840_v62 }
 0x531   :  { %3413 = vmatprep.subr.bf16.mxu1 %v3645_v3 }
 0x589   :  { %v617_v56 = vpop.permute.xlu0 %616 }
 0x58a   :  { %3096 = vmatmul.mubr.msk.f32.vlgmr.msra.gmra.mrb[12].mxu0 %vm232_vm3, %v617_v56 }
 0x58b   :  { %3397 = vmatpush3.bf16.msra.mxu0 %v3742_v9  ;;  %3117 = vmatprep.mubr.msk.f32.mxu0 %vm3646_vm1, %v3647_v4 }
 0x58c   :  { %3398 = vmatprep.subr.bf16.mxu0 %v3645_v3 }
 0x58f   :  { %3400 = vmatpush3.bf16.msra.mxu0 %v3764_v15 }
 0x590   :  { %3407 = vmatprep.subr.bf16.mxu0 %v3645_v3 }
 0x592   :  { %3118 = vmatmul.mubr.msk.f32.vlgmr.msra.gmra.mrb[14].mxu0 %vm232_vm3, %v617_v56 }
 0x593   :  { %3409 = vmatpush3.bf16.msra.mxu0 %v3816_v54  ;;  %3139 = vmatprep.mubr.msk.f32.mxu0 %vm3646_vm1, %v3647_v4 }
 0x594   :  { %3410 = vmatprep.subr.bf16.mxu0 %v3645_v3 }
 0x597   :  { %3412 = vmatpush3.bf16.msra.mxu0 %v3836_v61 }
 0x598   :  { %3419 = vmatprep.subr.bf16.mxu0 %v3645_v3 }
 0x5fe   :  { %v758_v57 = vpop.f32.mrb[4].mxu1 }
 0x5ff   :  { %v769_v59 = vadd.f32 %v758_v57, %v3863_v11  ;;  %v3108_v60 = vpop.f32.mrb[5].mxu1 }
 0x601   :  { %771 = vrot.lane.b32.xlu1 %v769_v59, %s3648_s27 }
 0x65d   :  { %v686_v63 = vpop.f32.mrb[12].mxu0 }
 0x65e   :  { %v687_v0 = vadd.f32 %v3884_v14, %v686_v63  ;;  %v3097_v1 = vpop.f32.mrb[13].mxu0 }
 0x65f   :  { %v1075_v1 = vld [vmem:[#allocation2 + $0x18] sm:$0xff] }
 0x660   :  { %v762_v2 = vadd.f32 %v758_v57, %v687_v0 }
 0x662   :  { %v2820_v5 = vmul.f32 -1.442695, %v762_v2 }
 0x664   :  { %3550 = vpow2.f32 %v2820_v5 }
 0x665   :  { %v863_v6 = vpop.f32.mrb[14].mxu0 }
 0x666   :  { %v874_v7 = vadd.f32 %v863_v6, %v3800_v37  ;;  %v3119_v8 = vpop.f32.mrb[15].mxu0  ;;  %v867_v19 = vadd.f32 %v863_v6, %v796_v18 }
 0x668   :  { %876 = vrot.lane.b32.xlu0 %v874_v7, %s3648_s27  ;;  %v2822_v20 = vmul.f32 -1.442695, %v867_v19 }
 0x66e   :  { %v3551_v10 = vpop.eup %3550 }
 0x66f   :  { %v766_v12 = vadd.f32 1.0, %v3551_v10 }
 0x671   :  { %3552 = vrcp.f32 %v766_v12 }
 0x672   :  { %3554 = vpow2.f32 %v2822_v20 }
 0x673   :  { %v772_v16 = vpop.permute.xlu1 %771 }
 0x67b   :  { %v3553_v13 = vpop.eup %3552 }
 0x67c   :  { %v774_v17 = vmul.f32 %v3553_v13, %v772_v16  ;;  %v3555_v21 = vpop.eup %3554  ;;  %v781_v32 = vsub.f32 1.0, %v3553_v13  ;;  %v787_v34 = vmul.f32 %v3553_v13, %v3893_v48 }
 0x67d   :  { %v871_v22 = vadd.f32 1.0, %v3555_v21 }
 0x67e   :  { %776 = vrot.lane.b32.xlu1 %v774_v17, %s3648_s27 }
 0x67f   :  { %3556 = vrcp.f32 %v871_v22 }
 0x689   :  { %v3557_v23 = vpop.eup %3556 }
 0x68a   :  { %v886_v38 = vsub.f32 1.0, %v3557_v23  ;;  %v892_v40 = vmul.f32 %v3557_v23, %v3898_v53 }
 0x6da   :  { %v877_v24 = vpop.permute.xlu0 %876 }
 0x6db   :  { %v879_v25 = vmul.f32 %v3557_v23, %v877_v24 }
 0x6dd   :  { %881 = vrot.lane.b32.xlu0 %v879_v25, %s3648_s27 }
 0x6f0   :  { %v777_v26 = vpop.permute.xlu1 %776 }
 0x6f1   :  { %v779_v27 = vadd.f32 %v777_v26, %v687_v0 }
 0x6f3   :  { %3558 = vtanh.f32 %v779_v27 }
 0x6fd   :  { %v3559_v28 = vpop.eup %3558 }
 0x6fe   :  { %783 = vrot.lane.b32.xlu1 %v3559_v28, %s3649_s7 }
 0x74f   :  { %v882_v29 = vpop.permute.xlu0 %881 }
 0x750   :  { %v884_v30 = vadd.f32 %v882_v29, %v796_v18 }
 0x752   :  { %3560 = vtanh.f32 %v884_v30 }
 0x75c   :  { %v3561_v31 = vpop.eup %3560 }
 0x75d   :  { %888 = vrot.lane.b32.xlu0 %v3561_v31, %s3649_s7 }
 0x770   :  { %v784_v33 = vpop.permute.xlu1 %783 }
 0x771   :  { %v786_v35 = vmul.f32 %v784_v33, %v781_v32 }
 0x773   :  { %v3934_v36 = vadd.f32 %v787_v34, %v786_v35 }
 0x775   :  { %790 = vrot.lane.b32.xlu1 %v3934_v36, %s3649_s7 }
 0x7cf   :  { %v889_v39 = vpop.permute.xlu0 %888 }
 0x7d0   :  { %v891_v41 = vmul.f32 %v889_v39, %v886_v38 }
 0x7d2   :  { %v3939_v42 = vadd.f32 %v892_v40, %v891_v41 }
 0x7d4   :  { %895 = vrot.lane.b32.xlu0 %v3939_v42, %s3649_s7 }
 0x7e7   :  { %v791_v43 = vpop.permute.xlu1 %790 }
 0x7e8   :  { %794 = vst.msk [vmem:[#allocation3 + $0x8] sm:$0xff] %vm232_vm3, %v791_v43  ;;  %3140 = vmatmul.mubr.msk.f32.vlgmr.msra.gmra.mrb[16].mxu0 %vm232_vm3, %v791_v43 }
 0x7e9   :  { %3421 = vmatpush3.bf16.msra.mxu0 %v3827_v58  ;;  %3161 = vmatprep.mubr.msk.f32.mxu0 %vm3646_vm1, %v3647_v4 }
 0x7ea   :  { %3422 = vmatprep.subr.bf16.mxu0 %v3645_v3 }
 0x7ed   :  { %3424 = vmatpush3.bf16.msra.mxu0 %v3840_v62 }
 0x7ee   :  { %3431 = vmatprep.subr.bf16.mxu0 %v3645_v3 }
 0x846   :  { %v896_v44 = vpop.permute.xlu0 %895 }
 0x847   :  { %3129 = vmatmul.mubr.msk.f32.vlgmr.msra.gmra.mrb[6].mxu1 %vm232_vm3, %v896_v44 }
 0x848   :  { %3415 = vmatpush3.bf16.msra.mxu1 %v3742_v9  ;;  %3150 = vmatprep.mubr.msk.f32.mxu1 %vm3646_vm1, %v3647_v4 }
 0x849   :  { %3416 = vmatprep.subr.bf16.mxu1 %v3645_v3 }
 0x84c   :  { %3418 = vmatpush3.bf16.msra.mxu1 %v3764_v15 }
 0x84d   :  { %3425 = vmatprep.subr.bf16.mxu1 %v3645_v3 }
 0x84f   :  { %3151 = vmatmul.mubr.msk.f32.vlgmr.msra.gmra.mrb[8].mxu1 %vm232_vm3, %v896_v44 }
 0x850   :  { %3427 = vmatpush3.bf16.msra.mxu1 %v3816_v54  ;;  %3172 = vmatprep.mubr.msk.f32.mxu1 %vm3646_vm1, %v3647_v4 }
 0x851   :  { %3428 = vmatprep.subr.bf16.mxu1 %v3645_v3 }
 0x854   :  { %3430 = vmatpush3.bf16.msra.mxu1 %v3836_v61 }
 0x855   :  { %3437 = vmatprep.subr.bf16.mxu1 %v3645_v3 }
 0x8bb   :  { %v1037_v45 = vpop.f32.mrb[16].mxu0 }
 0x8bc   :  { %v1048_v46 = vadd.f32 %v1037_v45, %v3863_v11  ;;  %v3141_v47 = vpop.f32.mrb[17].mxu0 }
 0x8be   :  { %1050 = vrot.lane.b32.xlu0 %v1048_v46, %s3648_s27 }
 0x91a   :  { %v965_v48 = vpop.f32.mrb[6].mxu1 }
 0x91b   :  { %v966_v49 = vadd.f32 %v3884_v14, %v965_v48  ;;  %v3130_v50 = vpop.f32.mrb[7].mxu1 }
 0x91c   :  { %v1354_v50 = vld [vmem:[#allocation2 + $0x20] sm:$0xff] }
 0x91d   :  { %v1041_v51 = vadd.f32 %v1037_v45, %v966_v49 }
 0x91f   :  { %v2825_v52 = vmul.f32 -1.442695, %v1041_v51 }
 0x921   :  { %3562 = vpow2.f32 %v2825_v52 }
 0x922   :  { %v1142_v53 = vpop.f32.mrb[8].mxu1 }
 0x923   :  { %v1153_v55 = vadd.f32 %v1142_v53, %v3800_v37  ;;  %v3152_v56 = vpop.f32.mrb[9].mxu1  ;;  %v1146_v2 = vadd.f32 %v1142_v53, %v1075_v1 }
 0x925   :  { %1155 = vrot.lane.b32.xlu1 %v1153_v55, %s3648_s27  ;;  %v2827_v5 = vmul.f32 -1.442695, %v1146_v2 }
 0x92b   :  { %v3563_v57 = vpop.eup %3562 }
 0x92c   :  { %v1045_v59 = vadd.f32 1.0, %v3563_v57 }
 0x92e   :  { %3564 = vrcp.f32 %v1045_v59 }
 0x92f   :  { %3566 = vpow2.f32 %v2827_v5 }
 0x930   :  { %v1051_v63 = vpop.permute.xlu0 %1050 }
 0x938   :  { %v3565_v60 = vpop.eup %3564 }
 0x939   :  { %v1053_v0 = vmul.f32 %v3565_v60, %v1051_v63  ;;  %v3567_v6 = vpop.eup %3566  ;;  %v1060_v21 = vsub.f32 1.0, %v3565_v60  ;;  %v1066_v23 = vmul.f32 %v3565_v60, %v3934_v36 }
 0x93a   :  { %v1150_v7 = vadd.f32 1.0, %v3567_v6 }
 0x93b   :  { %1055 = vrot.lane.b32.xlu0 %v1053_v0, %s3648_s27 }
 0x93c   :  { %3568 = vrcp.f32 %v1150_v7 }
 0x946   :  { %v3569_v8 = vpop.eup %3568 }
 0x947   :  { %v1165_v26 = vsub.f32 1.0, %v3569_v8  ;;  %v1171_v28 = vmul.f32 %v3569_v8, %v3939_v42 }
 0x997   :  { %v1156_v10 = vpop.permute.xlu1 %1155 }
 0x998   :  { %v1158_v12 = vmul.f32 %v3569_v8, %v1156_v10 }
 0x99a   :  { %1160 = vrot.lane.b32.xlu1 %v1158_v12, %s3648_s27 }
 0x9ad   :  { %v1056_v13 = vpop.permute.xlu0 %1055 }
 0x9ae   :  { %v1058_v16 = vadd.f32 %v1056_v13, %v966_v49 }
 0x9b0   :  { %3570 = vtanh.f32 %v1058_v16 }
 0x9ba   :  { %v3571_v17 = vpop.eup %3570 }
 0x9bb   :  { %1062 = vrot.lane.b32.xlu0 %v3571_v17, %s3649_s7 }
 0xa0c   :  { %v1161_v18 = vpop.permute.xlu1 %1160 }
 0xa0d   :  { %v1163_v19 = vadd.f32 %v1161_v18, %v1075_v1 }
 0xa0f   :  { %3572 = vtanh.f32 %v1163_v19 }
 0xa19   :  { %v3573_v20 = vpop.eup %3572 }
 0xa1a   :  { %1167 = vrot.lane.b32.xlu1 %v3573_v20, %s3649_s7 }
 0xa2d   :  { %v1063_v22 = vpop.permute.xlu0 %1062 }
 0xa2e   :  { %v1065_v24 = vmul.f32 %v1063_v22, %v1060_v21 }
 0xa30   :  { %v3975_v25 = vadd.f32 %v1066_v23, %v1065_v24 }
 0xa32   :  { %1069 = vrot.lane.b32.xlu0 %v3975_v25, %s3649_s7 }
 0xa8c   :  { %v1168_v27 = vpop.permute.xlu1 %1167 }
 0xa8d   :  { %v1170_v29 = vmul.f32 %v1168_v27, %v1165_v26 }
 0xa8f   :  { %v3980_v30 = vadd.f32 %v1171_v28, %v1170_v29 }
 0xa91   :  { %1174 = vrot.lane.b32.xlu1 %v3980_v30, %s3649_s7 }
 0xaa4   :  { %v1070_v31 = vpop.permute.xlu0 %1069 }
 0xaa5   :  { %1073 = vst.msk [vmem:[#allocation3 + $0x10] sm:$0xff] %vm232_vm3, %v1070_v31  ;;  %3173 = vmatmul.mubr.msk.f32.vlgmr.msra.gmra.mrb[10].mxu1 %vm232_vm3, %v1070_v31 }
 0xaa6   :  { %3439 = vmatpush3.bf16.msra.mxu1 %v3827_v58  ;;  %3194 = vmatprep.mubr.msk.f32.mxu1 %vm3646_vm1, %v3647_v4 }
 0xaa7   :  { %3440 = vmatprep.subr.bf16.mxu1 %v3645_v3 }
 0xaaa   :  { %3442 = vmatpush3.bf16.msra.mxu1 %v3840_v62 }
 0xaab   :  { %3449 = vmatprep.subr.bf16.mxu1 %v3645_v3 }
 0xb03   :  { %v1175_v32 = vpop.permute.xlu1 %1174 }
 0xb04   :  { %3162 = vmatmul.mubr.msk.f32.vlgmr.msra.gmra.mrb[18].mxu0 %vm232_vm3, %v1175_v32 }
 0xb05   :  { %3433 = vmatpush3.bf16.msra.mxu0 %v3742_v9  ;;  %3183 = vmatprep.mubr.msk.f32.mxu0 %vm3646_vm1, %v3647_v4 }
 0xb06   :  { %3434 = vmatprep.subr.bf16.mxu0 %v3645_v3 }
 0xb09   :  { %3436 = vmatpush3.bf16.msra.mxu0 %v3764_v15 }
 0xb0a   :  { %3443 = vmatprep.subr.bf16.mxu0 %v3645_v3 }
 0xb0c   :  { %3184 = vmatmul.mubr.msk.f32.vlgmr.msra.gmra.mrb[20].mxu0 %vm232_vm3, %v1175_v32 }
 0xb0d   :  { %3445 = vmatpush3.bf16.msra.mxu0 %v3816_v54  ;;  %3205 = vmatprep.mubr.msk.f32.mxu0 %vm3646_vm1, %v3647_v4 }
 0xb0e   :  { %3446 = vmatprep.subr.bf16.mxu0 %v3645_v3 }
 0xb11   :  { %3448 = vmatpush3.bf16.msra.mxu0 %v3836_v61 }
 0xb12   :  { %3455 = vmatprep.subr.bf16.mxu0 %v3645_v3 }
 0xb78   :  { %v1316_v33 = vpop.f32.mrb[10].mxu1 }
 0xb79   :  { %v1327_v34 = vadd.f32 %v1316_v33, %v3863_v11  ;;  %v3174_v35 = vpop.f32.mrb[11].mxu1 }
 0xb7b   :  { %1329 = vrot.lane.b32.xlu0 %v1327_v34, %s3648_s27 }
 0xbd7   :  { %v1244_v36 = vpop.f32.mrb[18].mxu0 }
 0xbd8   :  { %v1245_v38 = vadd.f32 %v3884_v14, %v1244_v36  ;;  %v3163_v39 = vpop.f32.mrb[19].mxu0 }
 0xbd9   :  { %v1633_v39 = vld [vmem:[#allocation2 + $0x28] sm:$0xff] }
 0xbda   :  { %v1320_v40 = vadd.f32 %v1316_v33, %v1245_v38 }
 0xbdc   :  { %v2830_v41 = vmul.f32 -1.442695, %v1320_v40 }
 0xbde   :  { %3574 = vpow2.f32 %v2830_v41 }
 0xbdf   :  { %v1421_v42 = vpop.f32.mrb[20].mxu0 }
 0xbe0   :  { %v1432_v43 = vadd.f32 %v1421_v42, %v3800_v37  ;;  %v3185_v44 = vpop.f32.mrb[21].mxu0  ;;  %v1425_v51 = vadd.f32 %v1421_v42, %v1354_v50 }
 0xbe2   :  { %1434 = vrot.lane.b32.xlu1 %v1432_v43, %s3648_s27  ;;  %v2832_v52 = vmul.f32 -1.442695, %v1425_v51 }
 0xbe8   :  { %v3575_v45 = vpop.eup %3574 }
 0xbe9   :  { %v1324_v46 = vadd.f32 1.0, %v3575_v45 }
 0xbeb   :  { %3576 = vrcp.f32 %v1324_v46 }
 0xbec   :  { %3578 = vpow2.f32 %v2832_v52 }
 0xbed   :  { %v1330_v48 = vpop.permute.xlu0 %1329 }
 0xbf5   :  { %v3577_v47 = vpop.eup %3576 }
 0xbf6   :  { %v1332_v49 = vmul.f32 %v3577_v47, %v1330_v48  ;;  %v3579_v53 = vpop.eup %3578  ;;  %v1339_v6 = vsub.f32 1.0, %v3577_v47  ;;  %v1345_v8 = vmul.f32 %v3577_v47, %v3975_v25 }
 0xbf7   :  { %v1429_v55 = vadd.f32 1.0, %v3579_v53 }
 0xbf8   :  { %1334 = vrot.lane.b32.xlu0 %v1332_v49, %s3648_s27 }
 0xbf9   :  { %3580 = vrcp.f32 %v1429_v55 }
 0xc03   :  { %v3581_v56 = vpop.eup %3580 }
 0xc04   :  { %v1444_v13 = vsub.f32 1.0, %v3581_v56  ;;  %v1450_v17 = vmul.f32 %v3581_v56, %v3980_v30 }
 0xc54   :  { %v1435_v57 = vpop.permute.xlu1 %1434 }
 0xc55   :  { %v1437_v59 = vmul.f32 %v3581_v56, %v1435_v57 }
 0xc57   :  { %1439 = vrot.lane.b32.xlu1 %v1437_v59, %s3648_s27 }
 0xc6a   :  { %v1335_v60 = vpop.permute.xlu0 %1334 }
 0xc6b   :  { %v1337_v63 = vadd.f32 %v1335_v60, %v1245_v38 }
 0xc6d   :  { %3582 = vtanh.f32 %v1337_v63 }
 0xc77   :  { %v3583_v0 = vpop.eup %3582 }
 0xc78   :  { %1341 = vrot.lane.b32.xlu0 %v3583_v0, %s3649_s7 }
 0xcc9   :  { %v1440_v1 = vpop.permute.xlu1 %1439 }
 0xcca   :  { %v1442_v2 = vadd.f32 %v1440_v1, %v1354_v50 }
 0xccc   :  { %3584 = vtanh.f32 %v1442_v2 }
 0xcd6   :  { %v3585_v5 = vpop.eup %3584 }
 0xcd7   :  { %1446 = vrot.lane.b32.xlu1 %v3585_v5, %s3649_s7 }
 0xcea   :  { %v1342_v7 = vpop.permute.xlu0 %1341 }
 0xceb   :  { %v1344_v10 = vmul.f32 %v1342_v7, %v1339_v6 }
 0xced   :  { %v4016_v12 = vadd.f32 %v1345_v8, %v1344_v10 }
 0xcef   :  { %1348 = vrot.lane.b32.xlu0 %v4016_v12, %s3649_s7 }
 0xd49   :  { %v1447_v16 = vpop.permute.xlu1 %1446 }
 0xd4a   :  { %v1449_v18 = vmul.f32 %v1447_v16, %v1444_v13 }
 0xd4c   :  { %v4021_v19 = vadd.f32 %v1450_v17, %v1449_v18 }
 0xd4e   :  { %1453 = vrot.lane.b32.xlu1 %v4021_v19, %s3649_s7 }
 0xd61   :  { %v1349_v20 = vpop.permute.xlu0 %1348 }
 0xd62   :  { %1352 = vst.msk [vmem:[#allocation3 + $0x18] sm:$0xff] %vm232_vm3, %v1349_v20  ;;  %3206 = vmatmul.mubr.msk.f32.vlgmr.msra.gmra.mrb[22].mxu0 %vm232_vm3, %v1349_v20 }
 0xd63   :  { %3457 = vmatpush3.bf16.msra.mxu0 %v3827_v58  ;;  %3227 = vmatprep.mubr.msk.f32.mxu0 %vm3646_vm1, %v3647_v4 }
 0xd64   :  { %3458 = vmatprep.subr.bf16.mxu0 %v3645_v3 }
 0xd67   :  { %3460 = vmatpush3.bf16.msra.mxu0 %v3840_v62 }
 0xd68   :  { %3467 = vmatprep.subr.bf16.mxu0 %v3645_v3 }
 0xdc0   :  { %v1454_v21 = vpop.permute.xlu1 %1453 }
 0xdc1   :  { %3195 = vmatmul.mubr.msk.f32.vlgmr.msra.gmra.mrb[12].mxu1 %vm232_vm3, %v1454_v21 }
 0xdc2   :  { %3451 = vmatpush3.bf16.msra.mxu1 %v3742_v9  ;;  %3216 = vmatprep.mubr.msk.f32.mxu1 %vm3646_vm1, %v3647_v4 }
 0xdc3   :  { %3452 = vmatprep.subr.bf16.mxu1 %v3645_v3 }
 0xdc6   :  { %3454 = vmatpush3.bf16.msra.mxu1 %v3764_v15 }
 0xdc7   :  { %3461 = vmatprep.subr.bf16.mxu1 %v3645_v3 }
 0xdc9   :  { %3217 = vmatmul.mubr.msk.f32.vlgmr.msra.gmra.mrb[14].mxu1 %vm232_vm3, %v1454_v21 }
 0xdca   :  { %3463 = vmatpush3.bf16.msra.mxu1 %v3816_v54  ;;  %3238 = vmatprep.mubr.msk.f32.mxu1 %vm3646_vm1, %v3647_v4 }
 0xdcb   :  { %3464 = vmatprep.subr.bf16.mxu1 %v3645_v3 }
 0xdce   :  { %3466 = vmatpush3.bf16.msra.mxu1 %v3836_v61 }
 0xdcf   :  { %3473 = vmatprep.subr.bf16.mxu1 %v3645_v3 }
 0xe35   :  { %v1595_v22 = vpop.f32.mrb[22].mxu0 }
 0xe36   :  { %v1606_v23 = vadd.f32 %v1595_v22, %v3863_v11  ;;  %v3207_v24 = vpop.f32.mrb[23].mxu0 }
 0xe38   :  { %1608 = vrot.lane.b32.xlu0 %v1606_v23, %s3648_s27 }
 0xe94   :  { %v1523_v25 = vpop.f32.mrb[12].mxu1 }
 0xe95   :  { %v1524_v26 = vadd.f32 %v3884_v14, %v1523_v25  ;;  %v3196_v27 = vpop.f32.mrb[13].mxu1 }
 0xe96   :  { %v1912_v27 = vld [vmem:[#allocation2 + $0x30] sm:$0xff] }
 0xe97   :  { %v1599_v28 = vadd.f32 %v1595_v22, %v1524_v26 }
 0xe99   :  { %v2835_v29 = vmul.f32 -1.442695, %v1599_v28 }
 0xe9b   :  { %3586 = vpow2.f32 %v2835_v29 }
 0xe9c   :  { %v1700_v30 = vpop.f32.mrb[14].mxu1 }
 0xe9d   :  { %v1711_v31 = vadd.f32 %v1700_v30, %v3800_v37  ;;  %v3218_v32 = vpop.f32.mrb[15].mxu1  ;;  %v1704_v40 = vadd.f32 %v1700_v30, %v1633_v39 }
 0xe9f   :  { %1713 = vrot.lane.b32.xlu1 %v1711_v31, %s3648_s27  ;;  %v2837_v41 = vmul.f32 -1.442695, %v1704_v40 }
 0xea5   :  { %v3587_v33 = vpop.eup %3586 }
 0xea6   :  { %v1603_v34 = vadd.f32 1.0, %v3587_v33 }
 0xea8   :  { %3588 = vrcp.f32 %v1603_v34 }
 0xea9   :  { %3590 = vpow2.f32 %v2837_v41 }
 0xeaa   :  { %v1609_v36 = vpop.permute.xlu0 %1608 }
 0xeb2   :  { %v3589_v35 = vpop.eup %3588 }
 0xeb3   :  { %v1611_v38 = vmul.f32 %v3589_v35, %v1609_v36  ;;  %v3591_v42 = vpop.eup %3590  ;;  %v1618_v53 = vsub.f32 1.0, %v3589_v35  ;;  %v1624_v56 = vmul.f32 %v3589_v35, %v4016_v12 }
 0xeb4   :  { %v1708_v43 = vadd.f32 1.0, %v3591_v42 }
 0xeb5   :  { %1613 = vrot.lane.b32.xlu0 %v1611_v38, %s3648_s27 }
 0xeb6   :  { %3592 = vrcp.f32 %v1708_v43 }
 0xec0   :  { %v3593_v44 = vpop.eup %3592 }
 0xec1   :  { %v1723_v60 = vsub.f32 1.0, %v3593_v44  ;;  %v1729_v0 = vmul.f32 %v3593_v44, %v4021_v19 }
 0xf11   :  { %v1714_v45 = vpop.permute.xlu1 %1713 }
 0xf12   :  { %v1716_v46 = vmul.f32 %v3593_v44, %v1714_v45 }
 0xf14   :  { %1718 = vrot.lane.b32.xlu1 %v1716_v46, %s3648_s27 }
 0xf27   :  { %v1614_v47 = vpop.permute.xlu0 %1613 }
 0xf28   :  { %v1616_v48 = vadd.f32 %v1614_v47, %v1524_v26 }
 0xf2a   :  { %3594 = vtanh.f32 %v1616_v48 }
 0xf34   :  { %v3595_v49 = vpop.eup %3594 }
 0xf35   :  { %1620 = vrot.lane.b32.xlu0 %v3595_v49, %s3649_s7 }
 0xf86   :  { %v1719_v50 = vpop.permute.xlu1 %1718 }
 0xf87   :  { %v1721_v51 = vadd.f32 %v1719_v50, %v1633_v39 }
 0xf89   :  { %3596 = vtanh.f32 %v1721_v51 }
 0xf93   :  { %v3597_v52 = vpop.eup %3596 }
 0xf94   :  { %1725 = vrot.lane.b32.xlu1 %v3597_v52, %s3649_s7 }
 0xfa7   :  { %v1621_v55 = vpop.permute.xlu0 %1620 }
 0xfa8   :  { %v1623_v57 = vmul.f32 %v1621_v55, %v1618_v53 }
 0xfaa   :  { %v4057_v59 = vadd.f32 %v1624_v56, %v1623_v57 }
 0xfac   :  { %1627 = vrot.lane.b32.xlu0 %v4057_v59, %s3649_s7 }
0x1006   :  { %v1726_v63 = vpop.permute.xlu1 %1725 }
0x1007   :  { %v1728_v1 = vmul.f32 %v1726_v63, %v1723_v60 }
0x1009   :  { %v4062_v2 = vadd.f32 %v1729_v0, %v1728_v1 }
0x100b   :  { %1732 = vrot.lane.b32.xlu1 %v4062_v2, %s3649_s7 }
0x101e   :  { %v1628_v5 = vpop.permute.xlu0 %1627 }
0x101f   :  { %1631 = vst.msk [vmem:[#allocation3 + $0x20] sm:$0xff] %vm232_vm3, %v1628_v5  ;;  %3239 = vmatmul.mubr.msk.f32.vlgmr.msra.gmra.mrb[16].mxu1 %vm232_vm3, %v1628_v5 }
0x1020   :  { %3475 = vmatpush3.bf16.msra.mxu1 %v3827_v58  ;;  %3260 = vmatprep.mubr.msk.f32.mxu1 %vm3646_vm1, %v3647_v4 }
0x1021   :  { %3476 = vmatprep.subr.bf16.mxu1 %v3645_v3 }
0x1024   :  { %3478 = vmatpush3.bf16.msra.mxu1 %v3840_v62 }
0x1025   :  { %3485 = vmatprep.subr.bf16.mxu1 %v3645_v3 }
0x107d   :  { %v1733_v6 = vpop.permute.xlu1 %1732 }
0x107e   :  { %3228 = vmatmul.mubr.msk.f32.vlgmr.msra.gmra.mrb[24].mxu0 %vm232_vm3, %v1733_v6 }
0x107f   :  { %3469 = vmatpush3.bf16.msra.mxu0 %v3742_v9  ;;  %3249 = vmatprep.mubr.msk.f32.mxu0 %vm3646_vm1, %v3647_v4 }
0x1080   :  { %3470 = vmatprep.subr.bf16.mxu0 %v3645_v3 }
0x1083   :  { %3472 = vmatpush3.bf16.msra.mxu0 %v3764_v15 }
0x1084   :  { %3479 = vmatprep.subr.bf16.mxu0 %v3645_v3 }
0x1086   :  { %3250 = vmatmul.mubr.msk.f32.vlgmr.msra.gmra.mrb[26].mxu0 %vm232_vm3, %v1733_v6 }
0x1087   :  { %3481 = vmatpush3.bf16.msra.mxu0 %v3816_v54  ;;  %3271 = vmatprep.mubr.msk.f32.mxu0 %vm3646_vm1, %v3647_v4 }
0x1088   :  { %3482 = vmatprep.subr.bf16.mxu0 %v3645_v3 }
0x108b   :  { %3484 = vmatpush3.bf16.msra.mxu0 %v3836_v61 }
0x108c   :  { %3491 = vmatprep.subr.bf16.mxu0 %v3645_v3 }
0x10f2   :  { %v1874_v7 = vpop.f32.mrb[16].mxu1 }
0x10f3   :  { %v1885_v8 = vadd.f32 %v1874_v7, %v3863_v11  ;;  %v3240_v10 = vpop.f32.mrb[17].mxu1 }
0x10f5   :  { %1887 = vrot.lane.b32.xlu0 %v1885_v8, %s3648_s27 }
0x1151   :  { %v1802_v12 = vpop.f32.mrb[24].mxu0 }
0x1152   :  { %v1803_v13 = vadd.f32 %v3884_v14, %v1802_v12  ;;  %v3229_v16 = vpop.f32.mrb[25].mxu0 }
0x1154   :  { %v1878_v17 = vadd.f32 %v1874_v7, %v1803_v13 }
0x1156   :  { %v2840_v18 = vmul.f32 -1.442695, %v1878_v17 }
0x1158   :  { %3598 = vpow2.f32 %v2840_v18 }
0x1159   :  { %v1979_v19 = vpop.f32.mrb[26].mxu0 }
0x115a   :  { %v1990_v20 = vadd.f32 %v1979_v19, %v3800_v37  ;;  %v3251_v21 = vpop.f32.mrb[27].mxu0  ;;  %v1983_v28 = vadd.f32 %v1979_v19, %v1912_v27 }
0x115b   :  { %v2478_v21 = vld [vmem:[%s4265_s9 + $0x8] sm:$0xff] }
0x115c   :  { %1992 = vrot.lane.b32.xlu1 %v1990_v20, %s3648_s27  ;;  %v2842_v29 = vmul.f32 -1.442695, %v1983_v28  ;;  %v2477_v20 = vld [vmem:[%s4265_s9] sm:$0xff] }
0x1162   :  { %v3599_v22 = vpop.eup %3598 }
0x1163   :  { %v1882_v23 = vadd.f32 1.0, %v3599_v22  ;;  %v3503_v22 = vpack.c.bf16 %v2478_v21, %v2477_v20 }
0x1165   :  { %3600 = vrcp.f32 %v1882_v23 }
0x1166   :  { %3602 = vpow2.f32 %v2842_v29 }
0x1167   :  { %v1888_v25 = vpop.permute.xlu0 %1887 }
0x116f   :  { %v3601_v24 = vpop.eup %3600 }
0x1170   :  { %v1890_v26 = vmul.f32 %v3601_v24, %v1888_v25  ;;  %v3603_v30 = vpop.eup %3602  ;;  %v1897_v42 = vsub.f32 1.0, %v3601_v24  ;;  %v1903_v44 = vmul.f32 %v3601_v24, %v4057_v59 }
0x1171   :  { %v1987_v31 = vadd.f32 1.0, %v3603_v30 }
0x1172   :  { %1892 = vrot.lane.b32.xlu0 %v1890_v26, %s3648_s27 }
0x1173   :  { %3604 = vrcp.f32 %v1987_v31 }
0x117d   :  { %v3605_v32 = vpop.eup %3604 }
0x117e   :  { %v2002_v47 = vsub.f32 1.0, %v3605_v32  ;;  %v2008_v49 = vmul.f32 %v3605_v32, %v4062_v2  ;;  %v2191_v2 = vld [vmem:[#allocation2 + $0x38] sm:$0xff] }
0x11ce   :  { %v1993_v33 = vpop.permute.xlu1 %1992 }
0x11cf   :  { %v1995_v34 = vmul.f32 %v3605_v32, %v1993_v33 }
0x11d1   :  { %1997 = vrot.lane.b32.xlu1 %v1995_v34, %s3648_s27  ;;  %v2625_v34 = vld [vmem:[%s4266_s11] sm:$0xff] }
0x11e4   :  { %v1893_v35 = vpop.permute.xlu0 %1892 }
0x11e5   :  { %v1895_v36 = vadd.f32 %v1893_v35, %v1803_v13  ;;  %v2626_v35 = vld [vmem:[%s4266_s11 + $0x8] sm:$0xff] }
0x11e7   :  { %3606 = vtanh.f32 %v1895_v36  ;;  %v3511_v36 = vpack.c.bf16 %v2626_v35, %v2625_v34  ;;  %v2770_v35 = vlaneseq }
0x11f1   :  { %v3607_v38 = vpop.eup %3606 }
0x11f2   :  { %1899 = vrot.lane.b32.xlu0 %v3607_v38, %s3649_s7  ;;  %v2479_v38 = vld [vmem:[%s4265_s9 + $0x10] sm:$0xff] }
0x1243   :  { %v1998_v39 = vpop.permute.xlu1 %1997 }
0x1244   :  { %v2000_v40 = vadd.f32 %v1998_v39, %v1912_v27  ;;  %v2480_v39 = vld [vmem:[%s4265_s9 + $0x18] sm:$0xff] }
0x1246   :  { %3608 = vtanh.f32 %v2000_v40  ;;  %v3507_v40 = vpack.c.bf16 %v2480_v39, %v2479_v38 }
0x1250   :  { %v3609_v41 = vpop.eup %3608 }
0x1251   :  { %2004 = vrot.lane.b32.xlu1 %v3609_v41, %s3649_s7 }
0x1264   :  { %v1900_v43 = vpop.permute.xlu0 %1899 }
0x1265   :  { %v1902_v45 = vmul.f32 %v1900_v43, %v1897_v42  ;;  %v2469_v42 = vld [vmem:[#allocation3] sm:$0xff]  ;;  %v2470_v43 = vld [vmem:[#allocation3 + $0x8] sm:$0xff] }
0x1267   :  { %v4098_v46 = vadd.f32 %v1903_v44, %v1902_v45  ;;  %v2471_v44 = vld [vmem:[#allocation3 + $0x10] sm:$0xff]  ;;  %v2472_v45 = vld [vmem:[#allocation3 + $0x18] sm:$0xff] }
0x1269   :  { %1906 = vrot.lane.b32.xlu0 %v4098_v46, %s3649_s7 }
0x12c3   :  { %v2005_v48 = vpop.permute.xlu1 %2004 }
0x12c4   :  { %v2007_v50 = vmul.f32 %v2005_v48, %v2002_v47 }
0x12c6   :  { %v4103_v51 = vadd.f32 %v2008_v49, %v2007_v50  ;;  %v2627_v49 = vld [vmem:[%s4266_s11 + $0x10] sm:$0xff]  ;;  %v2628_v50 = vld [vmem:[%s4266_s11 + $0x18] sm:$0xff] }
0x12c8   :  { %2011 = vrot.lane.b32.xlu1 %v4103_v51, %s3649_s7 }
0x12db   :  { %v1907_v52 = vpop.permute.xlu0 %1906 }
0x12dc   :  { %1910 = vst.msk [vmem:[#allocation3 + $0x28] sm:$0xff] %vm232_vm3, %v1907_v52  ;;  %3272 = vmatmul.mubr.msk.f32.vlgmr.msra.gmra.mrb[28].mxu0 %vm232_vm3, %v1907_v52  ;;  %v2629_v52 = vld [vmem:[%s4266_s11 + $0x20] sm:$0xff] }
0x12dd   :  { %3493 = vmatpush3.bf16.msra.mxu0 %v3827_v58  ;;  %3293 = vmatprep.mubr.msk.f32.mxu0 %vm3646_vm1, %v3647_v4 }
0x12de   :  { %3494 = vmatprep.subr.bf16.mxu0 %v3645_v3 }
0x12e1   :  { %3496 = vmatpush3.bf16.msra.mxu0 %v3840_v62 }
0x12e2   :  { %3504 = vmatprep.subr.bf16.mxu0 %v3503_v22 }
0x12e3   :  { %v2474_v47 = vld [vmem:[#allocation3 + $0x28] sm:$0xff] }
0x133a   :  { %v2012_v53 = vpop.permute.xlu1 %2011 }
0x133b   :  { %3261 = vmatmul.mubr.msk.f32.vlgmr.msra.gmra.mrb[18].mxu1 %vm232_vm3, %v2012_v53 }
0x133c   :  { %3487 = vmatpush3.bf16.msra.mxu1 %v3742_v9  ;;  %3282 = vmatprep.mubr.msk.f32.mxu1 %vm3646_vm1, %v3647_v4 }
0x133d   :  { %3488 = vmatprep.subr.bf16.mxu1 %v3645_v3 }
0x1340   :  { %3490 = vmatpush3.bf16.msra.mxu1 %v3764_v15 }
0x1341   :  { %3497 = vmatprep.subr.bf16.mxu1 %v3645_v3 }
0x1343   :  { %3283 = vmatmul.mubr.msk.f32.vlgmr.msra.gmra.mrb[20].mxu1 %vm232_vm3, %v2012_v53  ;;  %v2630_v53 = vld [vmem:[%s4266_s11 + $0x28] sm:$0xff] }
0x1344   :  { %3499 = vmatpush3.bf16.msra.mxu1 %v3816_v54  ;;  %3304 = vmatprep.mubr.msk.f32.mxu1 %vm3646_vm1, %v3647_v4 }
0x1345   :  { %3500 = vmatprep.subr.bf16.mxu1 %v3645_v3 }
0x1348   :  { %3502 = vmatpush3.bf16.msra.mxu1 %v3836_v61 }
0x1349   :  { %3512 = vmatprep.subr.bf16.mxu1 %v3511_v36 }
0x13af   :  { %v2153_v9 = vpop.f32.mrb[28].mxu0 }
0x13b0   :  { %v2164_v58 = vadd.f32 %v2153_v9, %v3863_v11  ;;  %v3273_v62 = vpop.f32.mrb[29].mxu0 }
0x13b1   :  { %v2632_v62 = vld [vmem:[%s4266_s11 + $0x38] sm:$0xff] }
0x13b2   :  { %2166 = vrot.lane.b32.xlu0 %v2164_v58, %s3648_s27  ;;  %v2631_v58 = vld [vmem:[%s4266_s11 + $0x30] sm:$0xff] }
0x140e   :  { %v2081_v15 = vpop.f32.mrb[18].mxu1 }
0x140f   :  { %v2082_v55 = vadd.f32 %v3884_v14, %v2081_v15  ;;  %v3262_v56 = vpop.f32.mrb[19].mxu1  ;;  %v3523_v15 = vpack.c.bf16 %v2632_v62, %v2631_v58 }
0x1411   :  { %v2157_v57 = vadd.f32 %v2153_v9, %v2082_v55  ;;  %v3519_v9 = vpack.c.bf16 %v2630_v53, %v2629_v52 }
0x1413   :  { %v2845_v59 = vmul.f32 -1.442695, %v2157_v57 }
0x1415   :  { %3610 = vpow2.f32 %v2845_v59 }
0x1416   :  { %v2258_v54 = vpop.f32.mrb[20].mxu1 }
0x1417   :  { %v2269_v4 = vadd.f32 %v2258_v54, %v3800_v37  ;;  %v3284_v60 = vpop.f32.mrb[21].mxu1  ;;  %v2262_v14 = vadd.f32 %v2258_v54, %v2191_v2  ;;  %v3644_v54 = vld [vmem:[%s4264_s6] ss:$0 sm:$0xff] }
0x1419   :  { %2271 = vrot.lane.b32.xlu1 %v2269_v4, %s3648_s27  ;;  %v2847_v5 = vmul.f32 -1.442695, %v2262_v14 }
0x141f   :  { %v3611_v3 = vpop.eup %3610 }
0x1420   :  { %v2161_v61 = vadd.f32 1.0, %v3611_v3 }
0x1422   :  { %3612 = vrcp.f32 %v2161_v61 }
0x1423   :  { %3614 = vpow2.f32 %v2847_v5 }
0x1424   :  { %v2167_v0 = vpop.permute.xlu0 %2166 }
0x142c   :  { %v3613_v63 = vpop.eup %3612 }
0x142d   :  { %v2169_v1 = vmul.f32 %v3613_v63, %v2167_v0  ;;  %v3615_v6 = vpop.eup %3614  ;;  %v2176_v23 = vsub.f32 1.0, %v3613_v63  ;;  %v2182_v25 = vmul.f32 %v3613_v63, %v4098_v46  ;;  %v2473_v46 = vld [vmem:[#allocation3 + $0x20] sm:$0xff] }
0x142e   :  { %v2266_v7 = vadd.f32 1.0, %v3615_v6  ;;  %v4197_v63 = vld [vmem:[%s4267_s10] ss:$0 sm:$0xff] }
0x142f   :  { %2171 = vrot.lane.b32.xlu0 %v2169_v1, %s3648_s27 }
0x1430   :  { %3616 = vrcp.f32 %v2266_v7 }
0x143a   :  { %v3617_v8 = vpop.eup %3616 }
0x143b   :  { %v2281_v28 = vsub.f32 1.0, %v3617_v8  ;;  %v2287_v30 = vmul.f32 %v3617_v8, %v4103_v51  ;;  %v3515_v51 = vpack.c.bf16 %v2628_v50, %v2627_v49 }
0x148b   :  { %v2272_v37 = vpop.permute.xlu1 %2271 }
0x148c   :  { %v2274_v10 = vmul.f32 %v3617_v8, %v2272_v37 }
0x148e   :  { %2276 = vrot.lane.b32.xlu1 %v2274_v10, %s3648_s27 }
0x14a1   :  { %v2172_v12 = vpop.permute.xlu0 %2171 }
0x14a2   :  { %v2174_v13 = vadd.f32 %v2172_v12, %v2082_v55 }
0x14a4   :  { %3618 = vtanh.f32 %v2174_v13 }
0x14ae   :  { %v3619_v16 = vpop.eup %3618 }
0x14af   :  { %2178 = vrot.lane.b32.xlu0 %v3619_v16, %s3649_s7 }
0x1500   :  { %v2277_v17 = vpop.permute.xlu1 %2276 }
0x1501   :  { %v2279_v18 = vadd.f32 %v2277_v17, %v2191_v2 }
0x1503   :  { %3620 = vtanh.f32 %v2279_v18 }
0x150d   :  { %v3621_v19 = vpop.eup %3620 }
0x150e   :  { %2283 = vrot.lane.b32.xlu1 %v3621_v19, %s3649_s7 }
0x1521   :  { %v2179_v24 = vpop.permute.xlu0 %2178 }
0x1522   :  { %v2181_v26 = vmul.f32 %v2179_v24, %v2176_v23 }
0x1524   :  { %v4143_v27 = vadd.f32 %v2182_v25, %v2181_v26 }
0x1526   :  { %2185 = vrot.lane.b32.xlu0 %v4143_v27, %s3649_s7 }
0x1580   :  { %v2284_v29 = vpop.permute.xlu1 %2283 }
0x1581   :  { %v2286_v31 = vmul.f32 %v2284_v29, %v2281_v28 }
0x1583   :  { %v2288_v32 = vadd.f32 %v2287_v30, %v2286_v31  ;;  %v2860_v30 = vld [vmem:[%s4268_s12] ss:$0 sm:$0xff] }
0x1585   :  { %2290 = vrot.lane.b32.xlu1 %v2288_v32, %s3649_s7 }
0x1598   :  { %v2186_v33 = vpop.permute.xlu0 %2185 }
0x1599   :  { %2189 = vst.msk [vmem:[#allocation3 + $0x30] sm:$0xff] %vm232_vm3, %v2186_v33  ;;  %3305 = vmatmul.mubr.msk.f32.vlgmr.msra.gmra.mrb[22].mxu1 %vm232_vm3, %v2186_v33 }
0x159a   :  { %3514 = vmatpush3.bf16.msra.mxu1 %v3511_v36 }
0x159b   :  { %3516 = vmatprep.subr.bf16.mxu1 %v3515_v51 }
0x159e   :  { %3518 = vmatpush3.bf16.msra.mxu1 %v3515_v51 }
0x159f   :  { %3520 = vmatprep.subr.bf16.mxu1 %v3519_v9 }
0x15a0   :  { %v2475_v48 = vld [vmem:[#allocation3 + $0x30] sm:$0xff] }
0x15a2   :  { %3522 = vmatpush3.bf16.msra.mxu1 %v3519_v9 }
0x15a3   :  { %3524 = vmatprep.subr.bf16.mxu1 %v3523_v15 }
0x15a6   :  { %3526 = vmatpush3.bf16.msra.mxu1 %v3523_v15 }
0x15f7   :  { %v2291_v41 = vpop.permute.xlu1 %2290 }
0x15f8   :  { %3294 = vmatmul.mubr.msk.f32.vlgmr.msra.gmra.mrb[30].mxu0 %vm232_vm3, %v2291_v41  ;;  %v2771_v41 = vand.u32 127, %v2770_v35 }
0x15f9   :  { %3506 = vmatpush3.bf16.msra.mxu0 %v3503_v22  ;;  %3315 = vmatprep.mubr.msk.f32.mxu0 %vm232_vm3, %v2469_v42 }
0x15fa   :  { %3508 = vmatprep.subr.bf16.mxu0 %v3507_v40  ;;  %vm2772_vm5 = vcmp.lt.s32.totalorder %v2771_v41, 13 }
0x15fd   :  { %3510 = vmatpush3.bf16.msra.mxu0 %v3507_v40 }
0x1600   :  { %3316 = vmatmul.mubr.msk.f32.vlgmr.msra.gmra.mrb[32].mxu0 %vm232_vm3, %v2470_v43 }
0x1601   :  { %3318 = vmatprep.mubr.msk.f32.mxu0 %vm232_vm3, %v2471_v44 }
0x1604   :  { %3319 = vmatmul.mubr.msk.f32.gmra.mrb[34].mxu0 %vm232_vm3, %v2472_v45 }
0x1605   :  { %3321 = vmatprep.mubr.msk.f32.mxu0 %vm232_vm3, %v2473_v46 }
0x1608   :  { %3322 = vmatmul.mubr.msk.f32.gmra.mrb[36].mxu0 %vm232_vm3, %v2474_v47 }
0x1609   :  { %3324 = vmatprep.mubr.msk.f32.mxu0 %vm232_vm3, %v2475_v48 }
0x166c   :  { %v2432_v55 = vpop.f32.mrb[22].mxu1 }
0x166d   :  { %v2443_v56 = vadd.f32 %v2432_v55, %v3863_v11  ;;  %v3306_v57 = vpop.f32.mrb[23].mxu1 }
0x166f   :  { %2445 = vrot.lane.b32.xlu0 %v2443_v56, %s3648_s27 }
0x16cb   :  { %v2360_v59 = vpop.f32.mrb[30].mxu0 }
0x16cc   :  { %v2361_v4 = vadd.f32 %v3644_v54, %v2360_v59  ;;  %v3295_v60 = vpop.f32.mrb[31].mxu0 }
0x16ce   :  { %v2436_v3 = vadd.f32 %v2432_v55, %v2361_v4 }
0x16d0   :  { %v2850_v61 = vmul.f32 -1.442695, %v2436_v3 }
0x16d2   :  { %3622 = vpow2.f32 %v2850_v61 }
0x16d3   :  { %v3317_v0 = vpop.f32.mrb[32].mxu0 }
0x16d4   :  { %v2584_v11 = vadd.f32 %v3317_v0, %v4197_v63  ;;  %v2578_v1 = vpop.f32.mrb[33].mxu0 }
0x16d5   :  { %v2579_v2 = vadd.f32 %v4197_v63, %v2578_v1 }
0x16d6   :  { %v2618_v6 = vmax.f32 %v2584_v11, 0.0 }
0x16d7   :  { %v2617_v14 = vmax.f32 %v2579_v2, 0.0  ;;  %v3320_v5 = vpop.f32.mrb[34].mxu0 }
0x16d8   :  { %v2594_v7 = vadd.f32 %v3320_v5, %v4197_v63  ;;  %v2588_v8 = vpop.f32.mrb[35].mxu0 }
0x16d9   :  { %v2589_v37 = vadd.f32 %v4197_v63, %v2588_v8  ;;  %3343 = vmatprep.mubr.msk.f32.mxu1 %vm2640_vm4, %v2617_v14 }
0x16da   :  { %3344 = vmatmul.mubr.msk.f32.vlgmr.msra.gmra.mrb[24].mxu1 %vm2640_vm4, %v2618_v6  ;;  %v2620_v16 = vmax.f32 %v2594_v7, 0.0 }
0x16db   :  { %v2619_v10 = vmax.f32 %v2589_v37, 0.0  ;;  %v3323_v12 = vpop.f32.mrb[36].mxu0 }
0x16dc   :  { %v3623_v13 = vpop.eup %3622  ;;  %v2604_v17 = vadd.f32 %v3323_v12, %v4197_v63  ;;  %v2598_v18 = vpop.f32.mrb[37].mxu0 }
0x16dd   :  { %v2440_v19 = vadd.f32 1.0, %v3623_v13  ;;  %v2599_v20 = vadd.f32 %v4197_v63, %v2598_v18  ;;  %3346 = vmatprep.mubr.msk.f32.mxu1 %vm2640_vm4, %v2619_v10 }
0x16de   :  { %3347 = vmatmul.mubr.msk.f32.gmra.mrb[26].mxu1 %vm2640_vm4, %v2620_v16  ;;  %v2622_v22 = vmax.f32 %v2604_v17, 0.0 }
0x16df   :  { %3624 = vrcp.f32 %v2440_v19  ;;  %v2621_v21 = vmax.f32 %v2599_v20, 0.0 }
0x16e1   :  { %3349 = vmatprep.mubr.msk.f32.mxu1 %vm2640_vm4, %v2621_v21  ;;  %v2446_v24 = vpop.permute.xlu0 %2445 }
0x16e2   :  { %3350 = vmatmul.mubr.msk.f32.gmra.mrb[28].mxu1 %vm2640_vm4, %v2622_v22 }
0x16e9   :  { %v3625_v23 = vpop.eup %3624 }
0x16ea   :  { %v2448_v25 = vmul.f32 %v3625_v23, %v2446_v24  ;;  %v2455_v55 = vsub.f32 1.0, %v3625_v23  ;;  %v2461_v57 = vmul.f32 %v3625_v23, %v4143_v27 }
0x16ec   :  { %2450 = vrot.lane.b32.xlu1 %v2448_v25, %s3648_s27 }
0x175e   :  { %v2451_v26 = vpop.permute.xlu1 %2450 }
0x175f   :  { %v2453_v28 = vadd.f32 %v2451_v26, %v2361_v4 }
0x1761   :  { %3626 = vtanh.f32 %v2453_v28 }
0x176b   :  { %v3627_v29 = vpop.eup %3626 }
0x176c   :  { %2457 = vrot.lane.b32.xlu0 %v3627_v29, %s3649_s7 }
0x17ad   :  { %v3345_v31 = vpop.f32.mrb[24].mxu1 }
0x17ae   :  { %v2737_v32 = vadd.f32 %v3345_v31, %v2860_v30  ;;  %v2731_v33 = vpop.f32.mrb[25].mxu1 }
0x17af   :  { %v2732_v34 = vadd.f32 %v2860_v30, %v2731_v33 }
0x17b0   :  { %3628 = vtanh.f32 %v2737_v32 }
0x17b1   :  { %3630 = vtanh.f32 %v2732_v34  ;;  %v3348_v36 = vpop.f32.mrb[26].mxu1 }
0x17b2   :  { %v2747_v38 = vadd.f32 %v3348_v36, %v2860_v30  ;;  %v2741_v39 = vpop.f32.mrb[27].mxu1 }
0x17b3   :  { %v2742_v40 = vadd.f32 %v2860_v30, %v2741_v39 }
0x17b4   :  { %3632 = vtanh.f32 %v2747_v38 }
0x17b5   :  { %3634 = vtanh.f32 %v2742_v40  ;;  %v3351_v42 = vpop.f32.mrb[28].mxu1 }
0x17b6   :  { %v2757_v43 = vadd.f32 %v3351_v42, %v2860_v30  ;;  %v2751_v44 = vpop.f32.mrb[29].mxu1 }
0x17b7   :  { %v2752_v45 = vadd.f32 %v2860_v30, %v2751_v44 }
0x17b8   :  { %3636 = vtanh.f32 %v2757_v43 }
0x17b9   :  { %3638 = vtanh.f32 %v2752_v45 }
0x17ba   :  { %v3629_v46 = vpop.eup %3628 }
0x17bb   :  { %v3631_v47 = vpop.eup %3630  ;;  %v2782_v48 = vsel %vm2772_vm5, %v2737_v32, %v3629_v46 }
0x17bc   :  { %2790 = vst [vmem:[%s4269_s13 + $0x8] sm:$0xff] %v2782_v48  ;;  %v2781_v49 = vsel %vm2772_vm5, %v2732_v34, %v3631_v47 }
0x17bd   :  { %2789 = vst [vmem:[%s4269_s13] sm:$0xff] %v2781_v49 }
0x17be   :  { %v3633_v50 = vpop.eup %3632 }
0x17bf   :  { %v3635_v51 = vpop.eup %3634  ;;  %v2784_v52 = vsel %vm2772_vm5, %v2747_v38, %v3633_v50 }
0x17c0   :  { %2792 = vst [vmem:[%s4269_s13 + $0x18] sm:$0xff] %v2784_v52  ;;  %v2783_v53 = vsel %vm2772_vm5, %v2742_v40, %v3635_v51 }
0x17c1   :  { %2791 = vst [vmem:[%s4269_s13 + $0x10] sm:$0xff] %v2783_v53 }
0x17c2   :  { %v3637_v9 = vpop.eup %3636 }
0x17c3   :  { %v3639_v58 = vpop.eup %3638  ;;  %v2786_v62 = vsel %vm2772_vm5, %v2757_v43, %v3637_v9 }
0x17c4   :  { %2794 = vst [vmem:[%s4269_s13 + $0x28] sm:$0xff] %v2786_v62  ;;  %v2785_v15 = vsel %vm2772_vm5, %v2752_v45, %v3639_v58 }
0x17c5   :  { %2793 = vst [vmem:[%s4269_s13 + $0x20] sm:$0xff] %v2785_v15 }
0x17de   :  { %v2458_v56 = vpop.permute.xlu0 %2457 }
0x17df   :  { %v2460_v59 = vmul.f32 %v2458_v56, %v2455_v55 }
0x17e1   :  { %v2462_v54 = vadd.f32 %v2461_v57, %v2460_v59 }
0x17e3   :  { %2464 = vrot.lane.b32.xlu1 %v2462_v54, %s3649_s7 }
0x1855   :  { %v2465_v4 = vpop.permute.xlu1 %2464 }
0x1856   :  { %2468 = vst.msk [vmem:[#allocation3 + $0x38] sm:$0xff] %vm232_vm3, %v2465_v4 }
0x185d   :  { %v2476_v60 = vld [vmem:[#allocation3 + $0x38] sm:$0xff] }
0x185e   :  { %3325 = vmatmul.mubr.msk.f32.gmra.mrb[38].mxu0 %vm232_vm3, %v2476_v60 }
0x1931   :  { %v3326_v3 = vpop.f32.mrb[38].mxu0 }
0x1932   :  { %v2614_v61 = vadd.f32 %v3326_v3, %v4197_v63  ;;  %v2608_v0 = vpop.f32.mrb[39].mxu0 }
0x1933   :  { %v2609_v11 = vadd.f32 %v4197_v63, %v2608_v0 }
0x1934   :  { %v2624_v2 = vmax.f32 %v2614_v61, 0.0 }
0x1935   :  { %v2623_v1 = vmax.f32 %v2609_v11, 0.0 }
0x1937   :  { %3352 = vmatprep.mubr.msk.f32.mxu1 %vm2640_vm4, %v2623_v1 }
0x1938   :  { %3353 = vmatmul.mubr.msk.f32.gmra.mrb[30].mxu1 %vm2640_vm4, %v2624_v2 }
0x1a0b   :  { %v3354_v27 = vpop.f32.mrb[30].mxu1 }
0x1a0c   :  { %v2767_v14 = vadd.f32 %v3354_v27, %v2860_v30  ;;  %v2761_v5 = vpop.f32.mrb[31].mxu1 }
0x1a0d   :  { %v2762_v6 = vadd.f32 %v2860_v30, %v2761_v5 }
0x1a0e   :  { %3640 = vtanh.f32 %v2767_v14 }
0x1a0f   :  { %3642 = vtanh.f32 %v2762_v6 }
0x1a18   :  { %v3641_v7 = vpop.eup %3640 }
0x1a19   :  { %v3643_v8 = vpop.eup %3642  ;;  %v2788_v37 = vsel %vm2772_vm5, %v2767_v14, %v3641_v7 }
0x1a1a   :  { %2796 = vst [vmem:[%s4269_s13 + $0x38] sm:$0xff] %v2788_v37  ;;  %v2787_v63 = vsel %vm2772_vm5, %v2762_v6, %v3643_v8 }
0x1a1b   :  { %2795 = vst [vmem:[%s4269_s13 + $0x30] sm:$0xff] %v2787_v63 }

</bundles_post_ra>
